<compile_context>
chip_gen: v7x
topology: tpu7x:2x2x1
jax: 0.10.0
libtpu: 0.0.40
codegen_flags: <defaults>
</compile_context>

<pallas_src>
import jax
import jax.numpy as jnp
from jax import lax
from jax.experimental import pallas as pl
from jax.experimental.pallas import tpu as pltpu

Z_DIM = 64          # z_dim of the module
IN_DIM = 512        # cl * h must equal 512
EPS = 1e-5          # PyTorch BatchNorm1d default eps


def vae4x_kernel(klmn_ref,                       # SMEM (4,) f32: k, l, m, n
                 a_ref, b_ref, c_ref, d_ref,     # VMEM (B, 512) bf16 each
                 w_enc_ref,                      # (512, 128) bf16, cols = [mu | logvar]
                 z_small_ref,                    # (2, 128) f32: row0=[b_mu|b_lv], row1=[bn_g|bn_b]
                 w_d1_ref,                       # (64, 512) bf16
                 dec_small_ref,                  # (4, 512) f32: b_d1, bn2_g, bn2_b, b_d2
                 w_d2_ref,                       # (512, 512) bf16
                 out_ref):                       # (B, 512)
    k = klmn_ref[0]
    l = klmn_ref[1]
    m = klmn_ref[2]
    n = klmn_ref[3]

    B = a_ref.shape[0]                           # static

    # torch.cat((a,b,c,d), dim=0) done in VMEM; inputs are already bf16.
    x = jnp.concatenate(
        [a_ref[...], b_ref[...], c_ref[...], d_ref[...]], axis=0)          # (4B, 512) bf16

    # --------------- packed small params (2 DMA tiles total) ----------------
    zs = z_small_ref[...]                        # (2, 128) f32
    enc_bias = zs[0:1, :]                        # (1, 128)  = [b_mu | b_lv]
    gamma = zs[1:2, :Z_DIM]                      # (1, 64)   bn gamma
    beta = zs[1:2, Z_DIM:]                       # (1, 64)   bn beta

    ds = dec_small_ref[...]                      # (4, 512) f32
    b_d1 = ds[0:1, :]
    bn2_g = ds[1:2, :]
    bn2_b = ds[2:3, :]
    b_d2 = ds[3:4, :]

    # ------------- encoder: single fused Linear(512, 2z) matmul -------------
    enc = jnp.dot(x, w_enc_ref[...],
                  preferred_element_type=jnp.float32) + enc_bias            # (4B, 128) f32

    # chunk(2, dim=1): lane slices of the fused result.
    mu3 = enc[:, :Z_DIM].reshape(4, B, Z_DIM)                               # (4, B, z)
    # a_std = exp(logvar); a_var = std**2 = exp(2*logvar); one EUP pass.
    var3 = jnp.exp(2.0 * enc[:, Z_DIM:]).reshape(4, B, Z_DIM)               # (4, B, z)

    # ---- per-chunk training-mode BatchNorm1d(z), vectorized over chunks ----
    mean = jnp.mean(mu3, axis=1, keepdims=True)                             # (4, 1, z)
    ex2 = jnp.mean(mu3 * mu3, axis=1, keepdims=True)
    var = jnp.maximum(ex2 - mean * mean, 0.0)                               # biased variance
    scale = gamma * lax.rsqrt(var + EPS)                                    # (4, 1, z)

    # Fold the mixing coefficients into the per-chunk scale/offset:
    #   mix = sum_i c_i * (mu_i*scale_i + beta - mean_i*scale_i)
    ws0 = k * scale[0]
    ws1 = l * scale[1]
    ws2 = m * scale[2]
    ws3 = n * scale[3]                                                      # (1, z) each
    off = ((k + l + m + n) * beta
           - (mean[0] * ws0 + mean[1] * ws1 + mean[2] * ws2 + mean[3] * ws3))
    mu = mu3[0] * ws0 + mu3[1] * ws1 + mu3[2] * ws2 + mu3[3] * ws3 + off    # (B, z)

    var_mix = k * var3[0] + l * var3[1] + m * var3[2] + n * var3[3]         # (B, z)
    # Matches torch.pow(mix, 0.5): NaN for negative mixes, same as PyTorch.
    z_q = mu + jnp.sqrt(var_mix)                                            # (B, z)

    # ------- decoder: Linear(z,512) -> BN(512) -> ReLU -> Linear(512,512) ---
    h1 = jnp.dot(z_q.astype(jnp.bfloat16), w_d1_ref[...],
                 preferred_element_type=jnp.float32) + b_d1                 # (B, 512)

    mean2 = jnp.mean(h1, axis=0, keepdims=True)
    ex2_2 = jnp.mean(h1 * h1, axis=0, keepdims=True)
    var2 = jnp.maximum(ex2_2 - mean2 * mean2, 0.0)
    scale2 = bn2_g * lax.rsqrt(var2 + EPS)
    h1 = jnp.maximum(h1 * scale2 + (bn2_b - mean2 * scale2), 0.0)           # BN + ReLU

    out = jnp.dot(h1.astype(jnp.bfloat16), w_d2_ref[...],
                  preferred_element_type=jnp.float32) + b_d2                # (B, 512)

    out_ref[...] = out.astype(out_ref.dtype)


def init_params(key):
    """Deterministic PyTorch-style init: U(-1/sqrt(fan_in), +1/sqrt(fan_in)).

    Weights stored (in, out) in bfloat16; the small f32 vectors are packed:
      z_small   (2, 128): row 0 = [b_mu | b_logvar], row 1 = [bn_gamma | bn_beta]
      dec_small (4, 512): rows = b_d1, bn2_gamma, bn2_beta, b_d2
    """
    ks = jax.random.split(key, 3)

    def linear(k_, fan_in, fan_out):
        kw, kb = jax.random.split(k_)
        bound = 1.0 / float(fan_in) ** 0.5
        w = jax.random.uniform(kw, (fan_in, fan_out), jnp.float32, -bound, bound)
        b = jax.random.uniform(kb, (fan_out,), jnp.float32, -bound, bound)
        return w, b

    w_enc, b_enc = linear(ks[0], IN_DIM, 2 * Z_DIM)      # columns already [mu | logvar]
    w_d1, b_d1 = linear(ks[1], Z_DIM, IN_DIM)
    w_d2, b_d2 = linear(ks[2], IN_DIM, IN_DIM)

    bn_g = jnp.ones((Z_DIM,), jnp.float32)               # BatchNorm1d default affine
    bn_b = jnp.zeros((Z_DIM,), jnp.float32)
    bn2_g = jnp.ones((IN_DIM,), jnp.float32)
    bn2_b = jnp.zeros((IN_DIM,), jnp.float32)

    z_small = jnp.stack([b_enc, jnp.concatenate([bn_g, bn_b])])   # (2, 128)
    dec_small = jnp.stack([b_d1, bn2_g, bn2_b, b_d2])             # (4, 512)

    return dict(
        w_enc=w_enc.astype(jnp.bfloat16),
        w_d1=w_d1.astype(jnp.bfloat16),
        w_d2=w_d2.astype(jnp.bfloat16),
        z_small=z_small,
        dec_small=dec_small,
    )


def vae_4x_forward(params, k, l, m, n, a, b, c, d, *, out_dtype=jnp.float32):
    batch, cl, h = a.shape
    assert cl * h == IN_DIM, "cl * h must be 512 to match nn.Linear(512, ...)"
    # Best perf when batch is a multiple of 16 (bf16 sublane pack); other sizes
    # are correct but incur sublane shuffles in the in-kernel concat.

    def prep(t):
        # a.view(batch, -1): free reshape; bf16 cast halves activation DMA bytes.
        return t.reshape(batch, IN_DIM).astype(jnp.bfloat16)

    a2, b2, c2, d2 = prep(a), prep(b), prep(c), prep(d)
    klmn = jnp.asarray([k, l, m, n], dtype=jnp.float32)       # scalar mix weights

    vmem = pl.BlockSpec(memory_space=pltpu.MemorySpace.VMEM)
    smem = pl.BlockSpec(memory_space=pltpu.MemorySpace.SMEM)

    out = pl.pallas_call(
        vae4x_kernel,
        out_shape=jax.ShapeDtypeStruct((batch, IN_DIM), out_dtype),
        in_specs=[smem] + [vmem] * 9,
        out_specs=vmem,
        compiler_params=pltpu.CompilerParams(
            # Safe on v7x's 64 MiB physical / 32 MiB scoped default as well as
            # on v5e/v6e's 128 MiB.
            vmem_limit_bytes=32 * 1024 * 1024,
        ),
    )(klmn,
      a2, b2, c2, d2,
      params["w_enc"], params["z_small"],
      params["w_d1"], params["dec_small"], params["w_d2"])

    return out.reshape(batch, cl, h)


if __name__ == "__main__":
    key = jax.random.PRNGKey(0)
    k_params, k_a, k_b, k_c, k_d = jax.random.split(key, 5)

    params = init_params(k_params)

    batch, cl, h = 16, 4, 128         # cl * h = 512; batch multiple of 16
    a = jax.random.normal(k_a, (batch, cl, h), jnp.float32)
    b = jax.random.normal(k_b, (batch, cl, h), jnp.float32)
    c = jax.random.normal(k_c, (batch, cl, h), jnp.float32)
    d = jax.random.normal(k_d, (batch, cl, h), jnp.float32)

    # mixing coefficients k, l, m, n (scalars)
    kk, ll, mm, nn = 0.4, 0.3, 0.2, 0.1

    out = vae_4x_forward(params, kk, ll, mm, nn, a, b, c, d)
    out = jax.block_until_ready(out)
    assert out.shape == (batch, cl, h)
    assert jnp.all(jnp.isfinite(out))
    print("KERNEL_OK")
</pallas_src>

<mosaic_0001>
module attributes {stable_mosaic.version = 11 : i64} {
  func.func @vae4x_kernel(%arg0: memref<4xf32, #tpu.memory_space<smem>>, %arg1: memref<16x512xbf16, #tpu.memory_space<vmem>>, %arg2: memref<16x512xbf16, #tpu.memory_space<vmem>>, %arg3: memref<16x512xbf16, #tpu.memory_space<vmem>>, %arg4: memref<16x512xbf16, #tpu.memory_space<vmem>>, %arg5: memref<512x128xbf16, #tpu.memory_space<vmem>>, %arg6: memref<2x128xf32, #tpu.memory_space<vmem>>, %arg7: memref<64x512xbf16, #tpu.memory_space<vmem>>, %arg8: memref<4x512xf32, #tpu.memory_space<vmem>>, %arg9: memref<512x512xbf16, #tpu.memory_space<vmem>>, %arg10: memref<16x512xf32, #tpu.memory_space<vmem>>) attributes {dimension_semantics = [], scalar_prefetch = 0 : i64, scratch_operands = 0 : i64, tpu.core_type = #tpu.core_type<tc>} {
    %c0 = arith.constant 0 : index
    %0 = memref.load %arg0[%c0] : memref<4xf32, #tpu.memory_space<smem>>
    %c1 = arith.constant 1 : index
    %1 = memref.load %arg0[%c1] : memref<4xf32, #tpu.memory_space<smem>>
    %c2 = arith.constant 2 : index
    %2 = memref.load %arg0[%c2] : memref<4xf32, #tpu.memory_space<smem>>
    %c3 = arith.constant 3 : index
    %3 = memref.load %arg0[%c3] : memref<4xf32, #tpu.memory_space<smem>>
    %c0_0 = arith.constant 0 : index
    %c0_1 = arith.constant 0 : index
    %4 = vector.load %arg1[%c0_0, %c0_1] : memref<16x512xbf16, #tpu.memory_space<vmem>>, vector<16x512xbf16>
    %c0_2 = arith.constant 0 : index
    %c0_3 = arith.constant 0 : index
    %5 = vector.load %arg2[%c0_2, %c0_3] : memref<16x512xbf16, #tpu.memory_space<vmem>>, vector<16x512xbf16>
    %c0_4 = arith.constant 0 : index
    %c0_5 = arith.constant 0 : index
    %6 = vector.load %arg3[%c0_4, %c0_5] : memref<16x512xbf16, #tpu.memory_space<vmem>>, vector<16x512xbf16>
    %c0_6 = arith.constant 0 : index
    %c0_7 = arith.constant 0 : index
    %7 = vector.load %arg4[%c0_6, %c0_7] : memref<16x512xbf16, #tpu.memory_space<vmem>>, vector<16x512xbf16>
    %8 = tpu.concatenate %4, %5, %6, %7 in 0 : vector<16x512xbf16>, vector<16x512xbf16>, vector<16x512xbf16>, vector<16x512xbf16> -> vector<64x512xbf16>
    %c0_8 = arith.constant 0 : index
    %c0_9 = arith.constant 0 : index
    %9 = vector.load %arg6[%c0_8, %c0_9] : memref<2x128xf32, #tpu.memory_space<vmem>>, vector<2x128xf32>
    %10 = vector.extract_strided_slice %9 {offsets = [0, 0], sizes = [1, 128], strides = [1, 1]} : vector<2x128xf32> to vector<1x128xf32>
    %11 = vector.extract_strided_slice %9 {offsets = [1, 0], sizes = [1, 64], strides = [1, 1]} : vector<2x128xf32> to vector<1x64xf32>
    %12 = vector.extract_strided_slice %9 {offsets = [1, 64], sizes = [1, 64], strides = [1, 1]} : vector<2x128xf32> to vector<1x64xf32>
    %c0_10 = arith.constant 0 : index
    %c0_11 = arith.constant 0 : index
    %13 = vector.load %arg8[%c0_10, %c0_11] : memref<4x512xf32, #tpu.memory_space<vmem>>, vector<4x512xf32>
    %14 = vector.extract_strided_slice %13 {offsets = [0, 0], sizes = [1, 512], strides = [1, 1]} : vector<4x512xf32> to vector<1x512xf32>
    %15 = vector.extract_strided_slice %13 {offsets = [1, 0], sizes = [1, 512], strides = [1, 1]} : vector<4x512xf32> to vector<1x512xf32>
    %16 = vector.extract_strided_slice %13 {offsets = [2, 0], sizes = [1, 512], strides = [1, 1]} : vector<4x512xf32> to vector<1x512xf32>
    %17 = vector.extract_strided_slice %13 {offsets = [3, 0], sizes = [1, 512], strides = [1, 1]} : vector<4x512xf32> to vector<1x512xf32>
    %c0_12 = arith.constant 0 : index
    %c0_13 = arith.constant 0 : index
    %18 = vector.load %arg5[%c0_12, %c0_13] : memref<512x128xbf16, #tpu.memory_space<vmem>>, vector<512x128xbf16>
    %cst = arith.constant dense<0.000000e+00> : vector<64x128xf32>
    %19 = tpu.matmul %8, %18, %cst {dimension_numbers = #tpu.dot_dimension_numbers<[1], [0], [0], [1], [0, 0, 1, 1], [], []>} : vector<64x512xbf16>, vector<512x128xbf16>, vector<64x128xf32> -> vector<64x128xf32>
    %20 = vector.broadcast %10 : vector<1x128xf32> to vector<64x128xf32>
    %21 = arith.addf %19, %20 : vector<64x128xf32>
    %22 = vector.extract_strided_slice %21 {offsets = [0, 0], sizes = [64, 64], strides = [1, 1]} : vector<64x128xf32> to vector<64x64xf32>
    %23 = vector.shape_cast %22 : vector<64x64xf32> to vector<4x16x64xf32>
    %24 = vector.extract_strided_slice %21 {offsets = [0, 64], sizes = [64, 64], strides = [1, 1]} : vector<64x128xf32> to vector<64x64xf32>
    %cst_14 = arith.constant 2.000000e+00 : f32
    %25 = vector.broadcast %cst_14 : f32 to vector<64x64xf32>
    %26 = arith.mulf %25, %24 : vector<64x64xf32>
    %27 = math.exp %26 : vector<64x64xf32>
    %28 = vector.shape_cast %27 : vector<64x64xf32> to vector<4x16x64xf32>
    %cst_15 = arith.constant dense<0.000000e+00> : vector<4x64xf32>
    %29 = vector.multi_reduction <add>, %23, %cst_15 [1] : vector<4x16x64xf32> to vector<4x64xf32>
    %30 = vector.shape_cast %29 : vector<4x64xf32> to vector<4x1x64xf32>
    %cst_16 = arith.constant 1.600000e+01 : f32
    %31 = vector.broadcast %cst_16 : f32 to vector<4x1x64xf32>
    %32 = arith.divf %30, %31 : vector<4x1x64xf32>
    %33 = arith.mulf %23, %23 : vector<4x16x64xf32>
    %cst_17 = arith.constant dense<0.000000e+00> : vector<4x64xf32>
    %34 = vector.multi_reduction <add>, %33, %cst_17 [1] : vector<4x16x64xf32> to vector<4x64xf32>
    %35 = vector.shape_cast %34 : vector<4x64xf32> to vector<4x1x64xf32>
    %cst_18 = arith.constant 1.600000e+01 : f32
    %36 = vector.broadcast %cst_18 : f32 to vector<4x1x64xf32>
    %37 = arith.divf %35, %36 : vector<4x1x64xf32>
    %38 = arith.mulf %32, %32 : vector<4x1x64xf32>
    %39 = arith.subf %37, %38 : vector<4x1x64xf32>
    %cst_19 = arith.constant 0.000000e+00 : f32
    %40 = vector.broadcast %cst_19 : f32 to vector<4x1x64xf32>
    %41 = arith.maximumf %39, %40 : vector<4x1x64xf32>
    %cst_20 = arith.constant 9.99999974E-6 : f32
    %42 = vector.broadcast %cst_20 : f32 to vector<4x1x64xf32>
    %43 = arith.addf %41, %42 : vector<4x1x64xf32>
    %44 = math.rsqrt %43 : vector<4x1x64xf32>
    %45 = vector.shape_cast %11 : vector<1x64xf32> to vector<1x1x64xf32>
    %46 = vector.broadcast %45 : vector<1x1x64xf32> to vector<4x1x64xf32>
    %47 = arith.mulf %46, %44 : vector<4x1x64xf32>
    %48 = vector.extract_strided_slice %47 {offsets = [0, 0, 0], sizes = [1, 1, 64], strides = [1, 1, 1]} : vector<4x1x64xf32> to vector<1x1x64xf32>
    %49 = vector.shape_cast %48 : vector<1x1x64xf32> to vector<1x64xf32>
    %50 = vector.broadcast %0 : f32 to vector<1x64xf32>
    %51 = arith.mulf %50, %49 : vector<1x64xf32>
    %52 = vector.extract_strided_slice %47 {offsets = [1, 0, 0], sizes = [1, 1, 64], strides = [1, 1, 1]} : vector<4x1x64xf32> to vector<1x1x64xf32>
    %53 = vector.shape_cast %52 : vector<1x1x64xf32> to vector<1x64xf32>
    %54 = vector.broadcast %1 : f32 to vector<1x64xf32>
    %55 = arith.mulf %54, %53 : vector<1x64xf32>
    %56 = vector.extract_strided_slice %47 {offsets = [2, 0, 0], sizes = [1, 1, 64], strides = [1, 1, 1]} : vector<4x1x64xf32> to vector<1x1x64xf32>
    %57 = vector.shape_cast %56 : vector<1x1x64xf32> to vector<1x64xf32>
    %58 = vector.broadcast %2 : f32 to vector<1x64xf32>
    %59 = arith.mulf %58, %57 : vector<1x64xf32>
    %60 = vector.extract_strided_slice %47 {offsets = [3, 0, 0], sizes = [1, 1, 64], strides = [1, 1, 1]} : vector<4x1x64xf32> to vector<1x1x64xf32>
    %61 = vector.shape_cast %60 : vector<1x1x64xf32> to vector<1x64xf32>
    %62 = vector.broadcast %3 : f32 to vector<1x64xf32>
    %63 = arith.mulf %62, %61 : vector<1x64xf32>
    %64 = arith.addf %0, %1 : f32
    %65 = arith.addf %64, %2 : f32
    %66 = arith.addf %65, %3 : f32
    %67 = vector.broadcast %66 : f32 to vector<1x64xf32>
    %68 = arith.mulf %67, %12 : vector<1x64xf32>
    %69 = vector.extract_strided_slice %32 {offsets = [0, 0, 0], sizes = [1, 1, 64], strides = [1, 1, 1]} : vector<4x1x64xf32> to vector<1x1x64xf32>
    %70 = vector.shape_cast %69 : vector<1x1x64xf32> to vector<1x64xf32>
    %71 = arith.mulf %70, %51 : vector<1x64xf32>
    %72 = vector.extract_strided_slice %32 {offsets = [1, 0, 0], sizes = [1, 1, 64], strides = [1, 1, 1]} : vector<4x1x64xf32> to vector<1x1x64xf32>
    %73 = vector.shape_cast %72 : vector<1x1x64xf32> to vector<1x64xf32>
    %74 = arith.mulf %73, %55 : vector<1x64xf32>
    %75 = arith.addf %71, %74 : vector<1x64xf32>
    %76 = vector.extract_strided_slice %32 {offsets = [2, 0, 0], sizes = [1, 1, 64], strides = [1, 1, 1]} : vector<4x1x64xf32> to vector<1x1x64xf32>
    %77 = vector.shape_cast %76 : vector<1x1x64xf32> to vector<1x64xf32>
    %78 = arith.mulf %77, %59 : vector<1x64xf32>
    %79 = arith.addf %75, %78 : vector<1x64xf32>
    %80 = vector.extract_strided_slice %32 {offsets = [3, 0, 0], sizes = [1, 1, 64], strides = [1, 1, 1]} : vector<4x1x64xf32> to vector<1x1x64xf32>
    %81 = vector.shape_cast %80 : vector<1x1x64xf32> to vector<1x64xf32>
    %82 = arith.mulf %81, %63 : vector<1x64xf32>
    %83 = arith.addf %79, %82 : vector<1x64xf32>
    %84 = arith.subf %68, %83 : vector<1x64xf32>
    %85 = vector.extract_strided_slice %23 {offsets = [0, 0, 0], sizes = [1, 16, 64], strides = [1, 1, 1]} : vector<4x16x64xf32> to vector<1x16x64xf32>
    %86 = vector.shape_cast %85 : vector<1x16x64xf32> to vector<16x64xf32>
    %87 = vector.broadcast %51 : vector<1x64xf32> to vector<16x64xf32>
    %88 = arith.mulf %86, %87 : vector<16x64xf32>
    %89 = vector.extract_strided_slice %23 {offsets = [1, 0, 0], sizes = [1, 16, 64], strides = [1, 1, 1]} : vector<4x16x64xf32> to vector<1x16x64xf32>
    %90 = vector.shape_cast %89 : vector<1x16x64xf32> to vector<16x64xf32>
    %91 = vector.broadcast %55 : vector<1x64xf32> to vector<16x64xf32>
    %92 = arith.mulf %90, %91 : vector<16x64xf32>
    %93 = arith.addf %88, %92 : vector<16x64xf32>
    %94 = vector.extract_strided_slice %23 {offsets = [2, 0, 0], sizes = [1, 16, 64], strides = [1, 1, 1]} : vector<4x16x64xf32> to vector<1x16x64xf32>
    %95 = vector.shape_cast %94 : vector<1x16x64xf32> to vector<16x64xf32>
    %96 = vector.broadcast %59 : vector<1x64xf32> to vector<16x64xf32>
    %97 = arith.mulf %95, %96 : vector<16x64xf32>
    %98 = arith.addf %93, %97 : vector<16x64xf32>
    %99 = vector.extract_strided_slice %23 {offsets = [3, 0, 0], sizes = [1, 16, 64], strides = [1, 1, 1]} : vector<4x16x64xf32> to vector<1x16x64xf32>
    %100 = vector.shape_cast %99 : vector<1x16x64xf32> to vector<16x64xf32>
    %101 = vector.broadcast %63 : vector<1x64xf32> to vector<16x64xf32>
    %102 = arith.mulf %100, %101 : vector<16x64xf32>
    %103 = arith.addf %98, %102 : vector<16x64xf32>
    %104 = vector.broadcast %84 : vector<1x64xf32> to vector<16x64xf32>
    %105 = arith.addf %103, %104 : vector<16x64xf32>
    %106 = vector.extract_strided_slice %28 {offsets = [0, 0, 0], sizes = [1, 16, 64], strides = [1, 1, 1]} : vector<4x16x64xf32> to vector<1x16x64xf32>
    %107 = vector.shape_cast %106 : vector<1x16x64xf32> to vector<16x64xf32>
    %108 = vector.broadcast %0 : f32 to vector<16x64xf32>
    %109 = arith.mulf %108, %107 : vector<16x64xf32>
    %110 = vector.extract_strided_slice %28 {offsets = [1, 0, 0], sizes = [1, 16, 64], strides = [1, 1, 1]} : vector<4x16x64xf32> to vector<1x16x64xf32>
    %111 = vector.shape_cast %110 : vector<1x16x64xf32> to vector<16x64xf32>
    %112 = vector.broadcast %1 : f32 to vector<16x64xf32>
    %113 = arith.mulf %112, %111 : vector<16x64xf32>
    %114 = arith.addf %109, %113 : vector<16x64xf32>
    %115 = vector.extract_strided_slice %28 {offsets = [2, 0, 0], sizes = [1, 16, 64], strides = [1, 1, 1]} : vector<4x16x64xf32> to vector<1x16x64xf32>
    %116 = vector.shape_cast %115 : vector<1x16x64xf32> to vector<16x64xf32>
    %117 = vector.broadcast %2 : f32 to vector<16x64xf32>
    %118 = arith.mulf %117, %116 : vector<16x64xf32>
    %119 = arith.addf %114, %118 : vector<16x64xf32>
    %120 = vector.extract_strided_slice %28 {offsets = [3, 0, 0], sizes = [1, 16, 64], strides = [1, 1, 1]} : vector<4x16x64xf32> to vector<1x16x64xf32>
    %121 = vector.shape_cast %120 : vector<1x16x64xf32> to vector<16x64xf32>
    %122 = vector.broadcast %3 : f32 to vector<16x64xf32>
    %123 = arith.mulf %122, %121 : vector<16x64xf32>
    %124 = arith.addf %119, %123 : vector<16x64xf32>
    %125 = math.sqrt %124 : vector<16x64xf32>
    %126 = arith.addf %105, %125 : vector<16x64xf32>
    %127 = arith.truncf %126 : vector<16x64xf32> to vector<16x64xbf16>
    %c0_21 = arith.constant 0 : index
    %c0_22 = arith.constant 0 : index
    %128 = vector.load %arg7[%c0_21, %c0_22] : memref<64x512xbf16, #tpu.memory_space<vmem>>, vector<64x512xbf16>
    %cst_23 = arith.constant dense<0.000000e+00> : vector<16x512xf32>
    %129 = tpu.matmul %127, %128, %cst_23 {dimension_numbers = #tpu.dot_dimension_numbers<[1], [0], [0], [1], [0, 0, 1, 1], [], []>} : vector<16x64xbf16>, vector<64x512xbf16>, vector<16x512xf32> -> vector<16x512xf32>
    %130 = vector.broadcast %14 : vector<1x512xf32> to vector<16x512xf32>
    %131 = arith.addf %129, %130 : vector<16x512xf32>
    %cst_24 = arith.constant dense<0.000000e+00> : vector<512xf32>
    %132 = vector.multi_reduction <add>, %131, %cst_24 [0] : vector<16x512xf32> to vector<512xf32>
    %133 = vector.shape_cast %132 : vector<512xf32> to vector<1x512xf32>
    %cst_25 = arith.constant 1.600000e+01 : f32
    %134 = vector.broadcast %cst_25 : f32 to vector<1x512xf32>
    %135 = arith.divf %133, %134 : vector<1x512xf32>
    %136 = arith.mulf %131, %131 : vector<16x512xf32>
    %cst_26 = arith.constant dense<0.000000e+00> : vector<512xf32>
    %137 = vector.multi_reduction <add>, %136, %cst_26 [0] : vector<16x512xf32> to vector<512xf32>
    %138 = vector.shape_cast %137 : vector<512xf32> to vector<1x512xf32>
    %cst_27 = arith.constant 1.600000e+01 : f32
    %139 = vector.broadcast %cst_27 : f32 to vector<1x512xf32>
    %140 = arith.divf %138, %139 : vector<1x512xf32>
    %141 = arith.mulf %135, %135 : vector<1x512xf32>
    %142 = arith.subf %140, %141 : vector<1x512xf32>
    %cst_28 = arith.constant 0.000000e+00 : f32
    %143 = vector.broadcast %cst_28 : f32 to vector<1x512xf32>
    %144 = arith.maximumf %142, %143 : vector<1x512xf32>
    %cst_29 = arith.constant 9.99999974E-6 : f32
    %145 = vector.broadcast %cst_29 : f32 to vector<1x512xf32>
    %146 = arith.addf %144, %145 : vector<1x512xf32>
    %147 = math.rsqrt %146 : vector<1x512xf32>
    %148 = arith.mulf %15, %147 : vector<1x512xf32>
    %149 = vector.broadcast %148 : vector<1x512xf32> to vector<16x512xf32>
    %150 = arith.mulf %131, %149 : vector<16x512xf32>
    %151 = arith.mulf %135, %148 : vector<1x512xf32>
    %152 = arith.subf %16, %151 : vector<1x512xf32>
    %153 = vector.broadcast %152 : vector<1x512xf32> to vector<16x512xf32>
    %154 = arith.addf %150, %153 : vector<16x512xf32>
    %cst_30 = arith.constant 0.000000e+00 : f32
    %155 = vector.broadcast %cst_30 : f32 to vector<16x512xf32>
    %156 = arith.maximumf %154, %155 : vector<16x512xf32>
    %157 = arith.truncf %156 : vector<16x512xf32> to vector<16x512xbf16>
    %c0_31 = arith.constant 0 : index
    %c0_32 = arith.constant 0 : index
    %158 = vector.load %arg9[%c0_31, %c0_32] : memref<512x512xbf16, #tpu.memory_space<vmem>>, vector<512x512xbf16>
    %cst_33 = arith.constant dense<0.000000e+00> : vector<16x512xf32>
    %159 = tpu.matmul %157, %158, %cst_33 {dimension_numbers = #tpu.dot_dimension_numbers<[1], [0], [0], [1], [0, 0, 1, 1], [], []>} : vector<16x512xbf16>, vector<512x512xbf16>, vector<16x512xf32> -> vector<16x512xf32>
    %160 = vector.broadcast %17 : vector<1x512xf32> to vector<16x512xf32>
    %161 = arith.addf %159, %160 : vector<16x512xf32>
    %c0_34 = arith.constant 0 : index
    %c0_35 = arith.constant 0 : index
    %162 = vector.load %arg10[%c0_34, %c0_35] : memref<16x512xf32, #tpu.memory_space<vmem>>, vector<16x512xf32>
    tpu.vector_store %arg10[%c0_34, %c0_35], %161 {strides = array<i32>} : memref<16x512xf32, #tpu.memory_space<vmem>>, vector<16x512xf32>,
    return
  }
}

</mosaic_0001>

<bundles_post_ra>
// kernel: tpu_custom_call.1
= control target key start
LH: loop header
LB: loop body
LE: loop exit
PB: predicated region body
PF: predicated region fallthrough
CT: control target
= control target key end

     0   :  { %15 = vsyncpa [#allocation5], 0  ;;  %s3616_s0 = inlined_call_operand.hbm [shape: f32[4], index: 0, kind: input, shape index: {}]   ;;  %s3617_s1 = inlined_call_operand.hbm [shape: bf16[16,512], index: 1, kind: input, shape index: {}]   ;;  %s3618_s2 = inlined_call_operand.hbm [shape: bf16[16,512], index: 2, kind: input, shape index: {}]   ;;  %s3619_s3 = inlined_call_operand.hbm [shape: bf16[16,512], index: 3, kind: input, shape index: {}]   ;;  %s3620_s4 = inlined_call_operand.hbm [shape: bf16[16,512], index: 4, kind: input, shape index: {}]   ;;  %s3621_s5 = inlined_call_operand.hbm [shape: bf16[512,128], index: 5, kind: input, shape index: {}]   ;;  %s3622_s6 = inlined_call_operand.vmem [shape: f32[2,128], index: 6, kind: input, shape index: {}]   ;;  %s3623_s7 = inlined_call_operand.hbm [shape: bf16[64,512], index: 7, kind: input, shape index: {}]   ;;  %s3624_s8 = inlined_call_operand.vmem [shape: f32[4,512], index: 8, kind: input, shape index: {}]   ;;  %s3625_s9 = inlined_call_operand.hbm [shape: bf16[512,512], index: 9, kind: input, shape index: {}]   ;;  %s3626_s10 = inlined_call_operand.hbm [shape: f32[16,512], index: 10, kind: output, shape index: {}]  }
   0x1   :  { %16 = vsyncpa [#allocation3], 0 }
   0x2   :  { %17 = vsyncpa [#allocation8], 0 }
   0x3   :  { %18 = vsyncpa [#allocation11], 0 }
   0x4   :  { %19 = vsyncpa [#allocation14], 0 }
   0x5   :  { %20 = vsyncpa [#allocation4], 0  ;;  %s3145_s13 = smov [#allocation7]   ;;  %s3146_s15 = smov [#allocation10]  }
   0x6   :  { %s46_s14 = sshll.u32 %s3145_s13, 4  ;;  %s70_s16 = sshll.u32 %s3146_s15, 4  ;;  %s47_s14 = int_to_ptr.vmem [resolvable:$true] %s46_s14  ;;  %s3216_s16 = int_to_ptr.vmem [resolvable:$true] %s70_s16 }
   0x7   :  { %s2947_s19 = scalar_lea.hbm %s3618_s2, 512 }
   0x8   :  { %p2948_p0 = scmp.ne.s32.totalorder %s3618_s2, %s2947_s19  ;;  %p2951_p1 = scmp.lt.u32.totalorder %s2947_s19, %s3618_s2 }
   0xa   :  { %p2953_p2 = pnand %p2951_p1, %p2948_p0 }
   0xc   :  { %2956 = shalt.err (!%p2953_p2)
}
   0xd   :  { %s2957_s24 = scalar_lea.vmem %s47_s14, 512  ;;  %p2962_p4 = scmp.lt.s32.totalorder %s47_s14, %s47_s14 }
   0xe   :  { %p2958_p3 = scmp.ne.s32.totalorder %s47_s14, %s2957_s24  ;;  %p2963_p5 = scmp.lt.s32.totalorder %s2957_s24, %s2957_s24 }
  0x10   :  { %p2964_p6 = por %p2963_p5, %p2962_p4 }
  0x12   :  { %p2965_p7 = pnand %p2964_p6, %p2958_p3 }
  0x14   :  { %2968 = shalt.err (!%p2965_p7)
}
  0x15   :  { %s3147_s25 = smov 256   ;;  %s3148_s26 = smov 16  }
  0x16   :  { %52 = dma.hbm_to_vmem [thread:$0]  %s3618_s2, 512, %s47_s14, [#allocation8], %s3147_s25, %s3147_s25, %s3148_s26  }
  0x17   :  { %s2969_s11 = scalar_lea.hbm %s3620_s4, 512 }
  0x18   :  { %p2970_p8 = scmp.ne.s32.totalorder %s3620_s4, %s2969_s11  ;;  %p2973_p9 = scmp.lt.u32.totalorder %s2969_s11, %s3620_s4 }
  0x1a   :  { %p2975_p10 = pnand %p2973_p9, %p2970_p8 }
  0x1c   :  { %2978 = shalt.err (!%p2975_p10)
}
  0x1d   :  { %s2979_s18 = scalar_lea.vmem %s3216_s16, 512  ;;  %p2984_p12 = scmp.lt.s32.totalorder %s3216_s16, %s3216_s16 }
  0x1e   :  { %p2980_p11 = scmp.ne.s32.totalorder %s3216_s16, %s2979_s18  ;;  %p2985_p13 = scmp.lt.s32.totalorder %s2979_s18, %s2979_s18 }
  0x20   :  { %p2986_p0 = por %p2985_p13, %p2984_p12 }
  0x22   :  { %p2987_p1 = pnand %p2986_p0, %p2980_p11 }
  0x24   :  { %2990 = shalt.err (!%p2987_p1)
}
  0x25   :  { %76 = dma.hbm_to_vmem [thread:$0]  %s3620_s4, 512, %s3216_s16, [#allocation11], %s3147_s25, %s3147_s25, %s3148_s26  }
  0x26   :  { %s3149_s19 = smov [#allocation13]   ;;  %s3150_s21 = smov [#allocation6]  }
  0x27   :  { %s96_s20 = sshll.u32 %s3149_s19, 4  ;;  %s34_s22 = sshll.u32 %s3150_s21, 4  ;;  %s97_s20 = int_to_ptr.vmem [resolvable:$true] %s96_s20  ;;  %s35_s22 = int_to_ptr.vmem [resolvable:$true] %s34_s22 }
  0x28   :  { %s2991_s27 = scalar_lea.hbm %s3623_s7, 2048 }
  0x29   :  { %p2992_p2 = scmp.ne.s32.totalorder %s3623_s7, %s2991_s27  ;;  %p2995_p3 = scmp.lt.u32.totalorder %s2991_s27, %s3623_s7 }
  0x2b   :  { %p2997_p4 = pnand %p2995_p3, %p2992_p2 }
  0x2d   :  { %3000 = shalt.err (!%p2997_p4)
}
  0x2e   :  { %s3001_s4 = scalar_lea.vmem %s97_s20, 2048  ;;  %p3006_p6 = scmp.lt.s32.totalorder %s97_s20, %s97_s20 }
  0x2f   :  { %p3002_p5 = scmp.ne.s32.totalorder %s97_s20, %s3001_s4  ;;  %p3007_p7 = scmp.lt.s32.totalorder %s3001_s4, %s3001_s4 }
  0x31   :  { %p3008_p8 = por %p3007_p7, %p3006_p6 }
  0x33   :  { %p3009_p9 = pnand %p3008_p8, %p3002_p5 }
  0x35   :  { %3012 = shalt.err (!%p3009_p9)
}
  0x36   :  { %102 = dma.hbm_to_vmem [thread:$0]  %s3623_s7, 2048, %s97_s20, [#allocation14], %s3147_s25, %s3147_s25, %s3148_s26  }
  0x37   :  { %s3013_s17 = scalar_lea.hbm %s3616_s0, 16 }
  0x38   :  { %p3014_p10 = scmp.ne.s32.totalorder %s3616_s0, %s3013_s17  ;;  %p3017_p11 = scmp.lt.u32.totalorder %s3013_s17, %s3616_s0 }
  0x3a   :  { %p3019_p12 = pnand %p3017_p11, %p3014_p10 }
  0x3c   :  { %3022 = shalt.err (!%p3019_p12)
}
  0x3d   :  { %s3151_s21 = smov [#allocation2]   ;;  %s3023_s27 = scalar_lea.hbm %s3617_s1, 512 }
  0x3e   :  { %28 = dma.hbm_to_smem %s3616_s0, 16, %s3151_s21, [#allocation5]  }
  0x3f   :  { %p3024_p13 = scmp.ne.s32.totalorder %s3617_s1, %s3023_s27  ;;  %p3027_p0 = scmp.lt.u32.totalorder %s3023_s27, %s3617_s1 }
  0x41   :  { %p3029_p1 = pnand %p3027_p0, %p3024_p13 }
  0x43   :  { %3032 = shalt.err (!%p3029_p1)
}
  0x44   :  { %s3033_s4 = scalar_lea.vmem %s35_s22, 512  ;;  %p3038_p3 = scmp.lt.s32.totalorder %s35_s22, %s35_s22 }
  0x45   :  { %p3034_p2 = scmp.ne.s32.totalorder %s35_s22, %s3033_s4  ;;  %p3039_p4 = scmp.lt.s32.totalorder %s3033_s4, %s3033_s4 }
  0x47   :  { %p3040_p5 = por %p3039_p4, %p3038_p3 }
  0x49   :  { %p3041_p6 = pnand %p3040_p5, %p3034_p2 }
  0x4b   :  { %3044 = shalt.err (!%p3041_p6)
}
  0x4c   :  { %40 = dma.hbm_to_vmem [thread:$0]  %s3617_s1, 512, %s35_s22, [#allocation3], %s3147_s25, %s3147_s25, %s3148_s26  }
  0x4d   :  { %s3152_s12 = smov [#allocation9]   ;;  %s3153_s15 = smov [#allocation12]  }
  0x4e   :  { %s58_s13 = sshll.u32 %s3152_s12, 4  ;;  %s82_s17 = sshll.u32 %s3153_s15, 4  ;;  %s59_s13 = int_to_ptr.vmem [resolvable:$true] %s58_s13  ;;  %s83_s17 = int_to_ptr.vmem [resolvable:$true] %s82_s17 }
  0x4f   :  { %s3045_s14 = scalar_lea.hbm %s3619_s3, 512 }
  0x50   :  { %p3046_p7 = scmp.ne.s32.totalorder %s3619_s3, %s3045_s14  ;;  %p3049_p8 = scmp.lt.u32.totalorder %s3045_s14, %s3619_s3 }
  0x52   :  { %p3051_p9 = pnand %p3049_p8, %p3046_p7 }
  0x54   :  { %3054 = shalt.err (!%p3051_p9)
}
  0x55   :  { %s3055_s1 = scalar_lea.vmem %s59_s13, 512  ;;  %p3060_p11 = scmp.lt.s32.totalorder %s59_s13, %s59_s13 }
  0x56   :  { %p3056_p10 = scmp.ne.s32.totalorder %s59_s13, %s3055_s1  ;;  %p3061_p12 = scmp.lt.s32.totalorder %s3055_s1, %s3055_s1 }
  0x58   :  { %p3062_p13 = por %p3061_p12, %p3060_p11 }
  0x5a   :  { %p3063_p0 = pnand %p3062_p13, %p3056_p10 }
  0x5c   :  { %3066 = shalt.err (!%p3063_p0)
}
  0x5d   :  { %64 = dma.hbm_to_vmem [thread:$0]  %s3619_s3, 512, %s59_s13, [#allocation8], %s3147_s25, %s3147_s25, %s3148_s26  }
  0x5e   :  { %s3067_s28 = scalar_lea.hbm %s3621_s5, 4096 }
  0x5f   :  { %p3068_p1 = scmp.ne.s32.totalorder %s3621_s5, %s3067_s28  ;;  %p3071_p2 = scmp.lt.u32.totalorder %s3067_s28, %s3621_s5 }
  0x61   :  { %p3073_p3 = pnand %p3071_p2, %p3068_p1 }
  0x63   :  { %3076 = shalt.err (!%p3073_p3)
}
  0x64   :  { %s3077_s0 = scalar_lea.vmem %s83_s17, 4096  ;;  %p3082_p5 = scmp.lt.s32.totalorder %s83_s17, %s83_s17 }
  0x65   :  { %p3078_p4 = scmp.ne.s32.totalorder %s83_s17, %s3077_s0  ;;  %p3083_p6 = scmp.lt.s32.totalorder %s3077_s0, %s3077_s0 }
  0x67   :  { %p3084_p7 = por %p3083_p6, %p3082_p5 }
  0x69   :  { %p3085_p8 = pnand %p3084_p7, %p3078_p4 }
  0x6b   :  { %3088 = shalt.err (!%p3085_p8)
}
  0x6c   :  { %s3154_s3 = smov 64   ;;  %s3155_s16 = smov 4  }
  0x6d   :  { %88 = dma.hbm_to_vmem [thread:$0]  %s3621_s5, 4096, %s83_s17, [#allocation11], %s3154_s3, %s3154_s3, %s3155_s16  }
  0x6e   :  { %s3156_s15 = smov [#allocation15]   ;;  %s3089_s19 = scalar_lea.hbm %s3625_s9, 16384 }
  0x6f   :  { %s110_s18 = sshll.u32 %s3156_s15, 4  ;;  %p3090_p9 = scmp.ne.s32.totalorder %s3625_s9, %s3089_s19  ;;  %s111_s18 = int_to_ptr.vmem [resolvable:$true] %s110_s18 }
  0x70   :  { %p3093_p10 = scmp.lt.u32.totalorder %s3089_s19, %s3625_s9 }
  0x72   :  { %p3095_p11 = pnand %p3093_p10, %p3090_p9 }
  0x74   :  { %3098 = shalt.err (!%p3095_p11)
}
  0x75   :  { %s3099_s22 = scalar_lea.vmem %s111_s18, 16384  ;;  %p3104_p13 = scmp.lt.s32.totalorder %s111_s18, %s111_s18 }
  0x76   :  { %p3100_p12 = scmp.ne.s32.totalorder %s111_s18, %s3099_s22  ;;  %p3105_p0 = scmp.lt.s32.totalorder %s3099_s22, %s3099_s22 }
  0x78   :  { %p3106_p1 = por %p3105_p0, %p3104_p13 }
  0x7a   :  { %p3107_p2 = pnand %p3106_p1, %p3100_p12 }
  0x7c   :  { %3110 = shalt.err (!%p3107_p2)
}
  0x7d   :  { %116 = dma.hbm_to_vmem [thread:$0]  %s3625_s9, 16384, %s111_s18, [#allocation14], %s3147_s25, %s3147_s25, %s3148_s26  }
  0x7e   :  { %3133 = dma.done.wait [#allocation5], 16  }
  0x7f   :  { %3134 = vsyncadd [#allocation5], 4294967280 }
  0x80   :  { %3135 = dma.done.wait [#allocation3], 512  }
  0x81   :  { %3136 = vsyncadd [#allocation3], 4294966784 }
  0x82   :  { %3137 = dma.done.wait [#allocation8], 1024  }
  0x83   :  { %3138 = vsyncadd [#allocation8], 4294966272 }
  0x84   :  { %3139 = dma.done.wait [#allocation11], 4608  }
  0x85   :  { %3140 = vsyncadd [#allocation11], 4294962688 }
  0x86   :  { %3141 = dma.done.wait [#allocation14], 18432  }
  0x87   :  { %3142 = vsyncadd [#allocation14], 4294948864 }
  0x88   :  { %141 = sfence }
  0x89   :  { %v2639_v0 = vld [vmem:[#allocation12 + $0x40] sm:$0xff]   ;;  %v2643_v4 = vld [vmem:[#allocation12 + $0x48] sm:$0xff]   ;;  %v2647_v8 = vld [vmem:[#allocation12 + $0x50] sm:$0xff]   ;;  %v310_v48 = vlaneseq  ;;  %vm660_vm0 = vcmask 523264   ;;  %s3364_s26 = sld [smem:[#allocation2 + $0x1]]  ;;  %s3366_s7 = sld [smem:[#allocation2 + $0x2]] }
  0x8a   :  { %v2640_v1 = vld [vmem:[#allocation12 + $0xc0] sm:$0xff]   ;;  %2527 = vmatprep.subr.bf16.mxu0 %v2639_v0  ;;  %v2644_v5 = vld [vmem:[#allocation12 + $0xc8] sm:$0xff]   ;;  %v2648_v9 = vld [vmem:[#allocation12 + $0xd0] sm:$0xff]   ;;  %s3368_s20 = sld [smem:[#allocation2 + $0x3]] }
  0x8b   :  { %v2641_v2 = vld [vmem:[#allocation12] sm:$0xff]   ;;  %2567 = vmatprep.subr.bf16.mxu1 %v2640_v1  ;;  %v2645_v6 = vld [vmem:[#allocation12 + $0x8] sm:$0xff]   ;;  %v2649_v10 = vld [vmem:[#allocation12 + $0x10] sm:$0xff]   ;;  %v3339_v49 = vshrl.u32 %v310_v48, 7 }
  0x8c   :  { %v2642_v3 = vld [vmem:[#allocation12 + $0x80] sm:$0xff]   ;;  %2528 = vmatpush3.bf16.msra.mxu0 %v2641_v2  ;;  %v2646_v7 = vld [vmem:[#allocation12 + $0x88] sm:$0xff]   ;;  %v2650_v11 = vld [vmem:[#allocation12 + $0x90] sm:$0xff]  }
  0x8d   :  { %2568 = vmatpush3.bf16.msra.mxu1 %v2642_v3  ;;  %2529 = vmatprep.subr.bf16.mxu0 %v2643_v4  ;;  %v2651_v12 = vld [vmem:[#allocation12 + $0x58] sm:$0xff]   ;;  %v2655_v16 = vld [vmem:[#allocation12 + $0x60] sm:$0xff]   ;;  %v2659_v20 = vld [vmem:[#allocation12 + $0x68] sm:$0xff]   ;;  %v3342_v50 = vsub.s32 0, %v3339_v49 }
  0x8e   :  { %2569 = vmatprep.subr.bf16.mxu1 %v2644_v5  ;;  %v2652_v13 = vld [vmem:[#allocation12 + $0xd8] sm:$0xff]   ;;  %v2656_v17 = vld [vmem:[#allocation12 + $0xe0] sm:$0xff]   ;;  %v2660_v21 = vld [vmem:[#allocation12 + $0xe8] sm:$0xff]  }
  0x8f   :  { %v2653_v14 = vld [vmem:[#allocation12 + $0x18] sm:$0xff]   ;;  %v2657_v18 = vld [vmem:[#allocation12 + $0x20] sm:$0xff]   ;;  %v2661_v22 = vld [vmem:[#allocation12 + $0x28] sm:$0xff]  }
  0x90   :  { %2530 = vmatpush3.bf16.msra.mxu0 %v2645_v6  ;;  %v2654_v15 = vld [vmem:[#allocation12 + $0x98] sm:$0xff]   ;;  %v2658_v19 = vld [vmem:[#allocation12 + $0xa0] sm:$0xff]   ;;  %v2662_v23 = vld [vmem:[#allocation12 + $0xa8] sm:$0xff]  }
  0x91   :  { %2570 = vmatpush3.bf16.msra.mxu1 %v2646_v7  ;;  %2531 = vmatprep.subr.bf16.mxu0 %v2647_v8  ;;  %v2663_v24 = vld [vmem:[#allocation12 + $0x70] sm:$0xff]   ;;  %v2667_v28 = vld [vmem:[#allocation12 + $0x78] sm:$0xff]   ;;  %v3347_v51 = vld [vmem:[%s3622_s6] sm:$0x3]  ;;  %s3357_s6 = sld [smem:[#allocation2]] }
  0x92   :  { %2571 = vmatprep.subr.bf16.mxu1 %v2648_v9  ;;  %v2664_v25 = vld [vmem:[#allocation12 + $0xf0] sm:$0xff]   ;;  %v2668_v29 = vld [vmem:[#allocation12 + $0xf8] sm:$0xff]   ;;  %v3351_v53 = vrot.slane %v3347_v51, %v3342_v50 }
  0x93   :  { %v2665_v26 = vld [vmem:[#allocation12 + $0x30] sm:$0xff]   ;;  %v2669_v30 = vld [vmem:[#allocation12 + $0x38] sm:$0xff]  }
  0x94   :  { %2532 = vmatpush3.bf16.msra.mxu0 %v2649_v10  ;;  %v2666_v27 = vld [vmem:[#allocation12 + $0xb0] sm:$0xff]   ;;  %v2670_v31 = vld [vmem:[#allocation12 + $0xb8] sm:$0xff]  }
  0x95   :  { %2572 = vmatpush3.bf16.msra.mxu1 %v2650_v11  ;;  %2533 = vmatprep.subr.bf16.mxu0 %v2651_v12  ;;  %v2671_v32 = vld [vmem:[#allocation6] ss:$16 sps:$4 sm:$0xff]   ;;  %v2673_v33 = vld [vmem:[#allocation6 + $0x4] ss:$16 sps:$4 sm:$0xff]   ;;  %v2674_v34 = vld [vmem:[#allocation6 + $0x8] ss:$16 sps:$4 sm:$0xff]  }
  0x96   :  { %2573 = vmatprep.subr.bf16.mxu1 %v2652_v13  ;;  %v2676_v35 = vld [vmem:[#allocation6 + $0xc] ss:$16 sps:$4 sm:$0xff]   ;;  %538 = vmatprep.mubr.bf16.mxu0 %v2673_v33  ;;  %v2677_v36 = vld [vmem:[#allocation7 + $0x4] ss:$16 sps:$4 sm:$0xff]   ;;  %v2681_v38 = vld [vmem:[#allocation7] ss:$16 sps:$4 sm:$0xff]  }
  0x97   :  { %603 = vmatprep.mubr.bf16.mxu1 %v2676_v35  ;;  %v2679_v37 = vld [vmem:[#allocation7 + $0xc] ss:$16 sps:$4 sm:$0xff]   ;;  %v2682_v39 = vld [vmem:[#allocation7 + $0x8] ss:$16 sps:$4 sm:$0xff]   ;;  %v2683_v40 = vld [vmem:[#allocation9 + $0x4] ss:$16 sps:$4 sm:$0xff]   ;;  %s782_s27 = sadd.f32 %s3364_s26, %s3357_s6 }
  0x98   :  { %2534 = vmatpush3.bf16.msra.mxu0 %v2653_v14  ;;  %v2685_v41 = vld [vmem:[#allocation9 + $0xc] ss:$16 sps:$4 sm:$0xff]   ;;  %v2687_v42 = vld [vmem:[#allocation9] ss:$16 sps:$4 sm:$0xff]   ;;  %v2688_v43 = vld [vmem:[#allocation9 + $0x8] ss:$16 sps:$4 sm:$0xff]  }
  0x99   :  { %2574 = vmatpush3.bf16.msra.mxu1 %v2654_v15  ;;  %2535 = vmatprep.subr.bf16.mxu0 %v2655_v16  ;;  %v2689_v44 = vld [vmem:[#allocation10 + $0x4] ss:$16 sps:$4 sm:$0xff]   ;;  %v2691_v45 = vld [vmem:[#allocation10 + $0xc] ss:$16 sps:$4 sm:$0xff]   ;;  %v2693_v46 = vld [vmem:[#allocation10] ss:$16 sps:$4 sm:$0xff]   ;;  %s783_s28 = sadd.f32 %s3366_s7, %s782_s27 }
  0x9a   :  { %2575 = vmatprep.subr.bf16.mxu1 %v2656_v17  ;;  %v2694_v47 = vld [vmem:[#allocation10 + $0x8] ss:$16 sps:$4 sm:$0xff]  }
  0x9b   :  { %s784_s29 = sadd.f32 %s3368_s20, %s783_s28 }
  0x9c   :  { %2536 = vmatpush3.bf16.msra.mxu0 %v2657_v18 }
  0x9d   :  { %2576 = vmatpush3.bf16.msra.mxu1 %v2658_v19  ;;  %2537 = vmatprep.subr.bf16.mxu0 %v2659_v20 }
  0x9e   :  { %2577 = vmatprep.subr.bf16.mxu1 %v2660_v21 }
  0xa0   :  { %2538 = vmatpush3.bf16.msra.mxu0 %v2661_v22 }
  0xa1   :  { %2578 = vmatpush3.bf16.msra.mxu1 %v2662_v23  ;;  %2539 = vmatprep.subr.bf16.mxu0 %v2663_v24 }
  0xa2   :  { %2579 = vmatprep.subr.bf16.mxu1 %v2664_v25 }
  0xa4   :  { %2540 = vmatpush3.bf16.msra.mxu0 %v2665_v26 }
  0xa5   :  { %2580 = vmatpush3.bf16.msra.mxu1 %v2666_v27  ;;  %2541 = vmatprep.subr.bf16.mxu0 %v2667_v28 }
  0xa6   :  { %2581 = vmatprep.subr.bf16.mxu1 %v2668_v29 }
  0xa8   :  { %2542 = vmatpush3.bf16.msra.mxu0 %v2669_v30 }
  0xa9   :  { %2582 = vmatpush3.bf16.msra.mxu1 %v2670_v31 }
  0xab   :  { %539 = vmatmul.mubr.bf16.vlgmr.msra.gmra.mrb[0].mxu0 %v2671_v32 }
  0xac   :  { %604 = vmatmul.mubr.bf16.vlgmr.msra.gmra.mrb[0].mxu1 %v2674_v34  ;;  %546 = vmatprep.mubr.bf16.mxu0 %v2677_v36  ;;  %v3384_v34 = vstv %s3357_s6  ;;  %v3387_v36 = vstv %s3364_s26 }
  0xad   :  { %611 = vmatprep.mubr.bf16.mxu1 %v2679_v37 }
  0xb3   :  { %547 = vmatmul.mubr.bf16.gmra.mrb[4].mxu0 %v2681_v38  ;;  %v3390_v38 = vstv %s3366_s7 }
  0xb4   :  { %612 = vmatmul.mubr.bf16.gmra.mrb[4].mxu1 %v2682_v39  ;;  %554 = vmatprep.mubr.bf16.mxu0 %v2683_v40 }
  0xb5   :  { %619 = vmatprep.mubr.bf16.mxu1 %v2685_v41 }
  0xbb   :  { %555 = vmatmul.mubr.bf16.gmra.mrb[8].mxu0 %v2687_v42 }
  0xbc   :  { %620 = vmatmul.mubr.bf16.gmra.mrb[8].mxu1 %v2688_v43  ;;  %562 = vmatprep.mubr.bf16.mxu0 %v2689_v44  ;;  %v3398_v44 = vstv %s3368_s20 }
  0xbd   :  { %627 = vmatprep.mubr.bf16.mxu1 %v2691_v45 }
  0xc3   :  { %563 = vmatmul.mubr.bf16.gmra.mrb[12].mxu0 %v2693_v46 }
  0xc4   :  { %628 = vmatmul.mubr.bf16.gmra.mrb[12].mxu1 %v2694_v47 }
 0x17e   :  { %v2543_v52 = vpop.f32.mrb[0].mxu0 }
 0x17f   :  { %v2583_v54 = vpop.f32.mrb[0].mxu1  ;;  %v2544_v55 = vpop.f32.mrb[1].mxu0 }
 0x180   :  { %v2545_v56 = vadd.f32 %v2544_v55, %v2543_v52  ;;  %v2584_v57 = vpop.f32.mrb[1].mxu1  ;;  %v2546_v58 = vpop.f32.mrb[2].mxu0 }
 0x181   :  { %v2585_v59 = vadd.f32 %v2584_v57, %v2583_v54  ;;  %v2586_v60 = vpop.f32.mrb[2].mxu1  ;;  %v2547_v61 = vpop.f32.mrb[3].mxu0 }
 0x182   :  { %v541_v62 = vadd.f32 %v2545_v56, %v3351_v53  ;;  %v2548_v63 = vadd.f32 %v2547_v61, %v2546_v58  ;;  %v2587_v0 = vpop.f32.mrb[3].mxu1 }
 0x183   :  { %v2588_v1 = vadd.f32 %v2587_v0, %v2586_v60 }
 0x184   :  { %v3354_v2 = vadd.f32 %v2585_v59, %v541_v62  ;;  %v544_v3 = vadd.f32 %v2548_v63, %v3351_v53 }
 0x186   :  { %v636_v4 = vmul.f32 2.0, %v3354_v2  ;;  %v702_v5 = vmul.f32 %v3354_v2, %v3354_v2  ;;  %v3362_v6 = vadd.f32 %v2588_v1, %v544_v3  ;;  %v2549_v7 = vpop.f32.mrb[4].mxu0  ;;  %v661_v11 = vsel %vm660_vm0, %v3354_v2, 0.0 }
 0x187   :  { %v2589_v8 = vpop.f32.mrb[4].mxu1  ;;  %v2550_v9 = vpop.f32.mrb[5].mxu0 }
 0x188   :  { %v644_v10 = vmul.f32 1.442695, %v636_v4  ;;  %v637_v12 = vmul.f32 2.0, %v3362_v6  ;;  %v662_v13 = vsel %vm660_vm0, %v3362_v6, 0.0  ;;  %v2590_v14 = vpop.f32.mrb[5].mxu1  ;;  %v703_v16 = vmul.f32 %v3362_v6, %v3362_v6  ;;  %v2552_v19 = vpop.f32.mrb[6].mxu0 }
 0x189   :  { %v663_v15 = vadd.f32 %v662_v13, %v661_v11  ;;  %v2551_v17 = vadd.f32 %v2550_v9, %v2549_v7  ;;  %v2591_v18 = vadd.f32 %v2590_v14, %v2589_v8  ;;  %v2592_v20 = vpop.f32.mrb[6].mxu1  ;;  %v710_v21 = vsel %vm660_vm0, %v702_v5, 0.0  ;;  %v2553_v23 = vpop.f32.mrb[7].mxu0 }
 0x18a   :  { %2911 = vpow2.f32 %v644_v10  ;;  %v646_v22 = vmul.f32 1.442695, %v637_v12  ;;  %v2593_v24 = vpop.f32.mrb[7].mxu1  ;;  %v711_v26 = vsel %vm660_vm0, %v703_v16, 0.0  ;;  %v2554_v28 = vadd.f32 %v2553_v23, %v2552_v19 }
 0x18b   :  { %v664_v25 = vrot.slane %v663_v15, 4  ;;  %v549_v27 = vadd.f32 %v2551_v17, %v3351_v53  ;;  %v712_v29 = vadd.f32 %v711_v26, %v710_v21  ;;  %v2594_v30 = vadd.f32 %v2593_v24, %v2592_v20 }
 0x18c   :  { %2913 = vpow2.f32 %v646_v22  ;;  %v552_v32 = vadd.f32 %v2554_v28, %v3351_v53 }
 0x18d   :  { %v3380_v31 = vadd.f32 %v2591_v18, %v549_v27  ;;  %v665_v33 = vadd.f32 %v664_v25, %v663_v15  ;;  %v713_v35 = vrot.slane %v712_v29, 4 }
 0x18e   :  { %v2555_v37 = vpop.f32.mrb[8].mxu0  ;;  %v3395_v41 = vadd.f32 %v2594_v30, %v552_v32 }
 0x18f   :  { %v638_v39 = vmul.f32 2.0, %v3380_v31  ;;  %v704_v40 = vmul.f32 %v3380_v31, %v3380_v31  ;;  %v2595_v42 = vpop.f32.mrb[8].mxu1  ;;  %v2556_v43 = vpop.f32.mrb[9].mxu0  ;;  %v714_v45 = vadd.f32 %v713_v35, %v712_v29  ;;  %v670_v46 = vsel %vm660_vm0, %v3380_v31, 0.0 }
 0x190   :  { %v2557_v47 = vadd.f32 %v2556_v43, %v2555_v37  ;;  %v2596_v48 = vpop.f32.mrb[9].mxu1  ;;  %v2558_v52 = vpop.f32.mrb[10].mxu0  ;;  %v666_v54 = vrot.slane %v665_v33, 2  ;;  %v639_v57 = vmul.f32 2.0, %v3395_v41  ;;  %v671_v58 = vsel %vm660_vm0, %v3395_v41, 0.0 }
 0x191   :  { %v648_v55 = vmul.f32 1.442695, %v638_v39  ;;  %v719_v56 = vsel %vm660_vm0, %v704_v40, 0.0  ;;  %v2598_v59 = vpop.f32.mrb[10].mxu1  ;;  %v715_v60 = vrot.slane %v714_v45, 2  ;;  %v672_v61 = vadd.f32 %v671_v58, %v670_v46  ;;  %v2559_v0 = vpop.f32.mrb[11].mxu0 }
 0x192   :  { %v705_v62 = vmul.f32 %v3395_v41, %v3395_v41  ;;  %v557_v63 = vadd.f32 %v2557_v47, %v3351_v53  ;;  %v2599_v1 = vpop.f32.mrb[11].mxu1  ;;  %v650_v3 = vmul.f32 1.442695, %v639_v57  ;;  %v2597_v4 = vadd.f32 %v2596_v48, %v2595_v42 }
 0x193   :  { %2915 = vpow2.f32 %v648_v55  ;;  %v2560_v5 = vadd.f32 %v2559_v0, %v2558_v52  ;;  %v673_v8 = vrot.slane %v672_v61, 4  ;;  %v2600_v10 = vadd.f32 %v2599_v1, %v2598_v59 }
 0x194   :  { %v2912_v7 = vpop.eup %2911  ;;  %v720_v9 = vsel %vm660_vm0, %v705_v62, 0.0  ;;  %v667_v11 = vadd.f32 %v666_v54, %v665_v33  ;;  %2917 = vpow2.f32 %v650_v3  ;;  %v3411_v14 = vadd.f32 %v2597_v4, %v557_v63 }
 0x195   :  { %v839_v12 = vmul.f32 %v2912_v7, %v3384_v34  ;;  %v721_v13 = vadd.f32 %v720_v9, %v719_v56  ;;  %v560_v16 = vadd.f32 %v2560_v5, %v3351_v53  ;;  %v674_v19 = vadd.f32 %v673_v8, %v672_v61 }
 0x196   :  { %v2914_v15 = vpop.eup %2913  ;;  %v2561_v17 = vpop.f32.mrb[12].mxu0  ;;  %v668_v18 = vrot.slane %v667_v11, 1  ;;  %v3414_v20 = vadd.f32 %v715_v60, %v714_v45  ;;  %v640_v23 = vmul.f32 2.0, %v3411_v14  ;;  %v679_v24 = vsel %vm660_vm0, %v3411_v14, 0.0 }
 0x197   :  { %v840_v21 = vmul.f32 %v2914_v15, %v3384_v34  ;;  %v722_v22 = vrot.slane %v721_v13, 4  ;;  %v2601_v25 = vpop.f32.mrb[12].mxu1  ;;  %v2562_v26 = vpop.f32.mrb[13].mxu0  ;;  %v706_v27 = vmul.f32 %v3411_v14, %v3411_v14  ;;  %v3422_v28 = vadd.f32 %v2600_v10, %v560_v16 }
 0x198   :  { %v2563_v29 = vadd.f32 %v2562_v26, %v2561_v17  ;;  %v2602_v30 = vpop.f32.mrb[13].mxu1  ;;  %v2564_v32 = vpop.f32.mrb[14].mxu0  ;;  %v669_v33 = vadd.f32 %v668_v18, %v667_v11  ;;  %v652_v37 = vmul.f32 1.442695, %v640_v23  ;;  %v675_v43 = vrot.slane %v674_v19, 2 }
 0x199   :  { %v723_v35 = vadd.f32 %v722_v22, %v721_v13  ;;  %v2603_v39 = vadd.f32 %v2602_v30, %v2601_v25  ;;  %v2604_v40 = vpop.f32.mrb[14].mxu1  ;;  %v2565_v42 = vpop.f32.mrb[15].mxu0  ;;  %v728_v45 = vsel %vm660_vm0, %v706_v27, 0.0  ;;  %v641_v46 = vmul.f32 2.0, %v3422_v28 }
 0x19a   :  { %v680_v47 = vsel %vm660_vm0, %v3422_v28, 0.0  ;;  %v707_v48 = vmul.f32 %v3422_v28, %v3422_v28  ;;  %v2605_v52 = vpop.f32.mrb[15].mxu1  ;;  %2919 = vpow2.f32 %v652_v37  ;;  %v565_v56 = vadd.f32 %v2563_v29, %v3351_v53 }
 0x19b   :  { %v724_v54 = vrot.slane %v723_v35, 2  ;;  %v681_v55 = vadd.f32 %v680_v47, %v679_v24  ;;  %v654_v57 = vmul.f32 1.442695, %v641_v46  ;;  %v2566_v59 = vadd.f32 %v2565_v42, %v2564_v32 }
 0x19c   :  { %v729_v58 = vsel %vm660_vm0, %v707_v48, 0.0  ;;  %v2606_v60 = vadd.f32 %v2605_v52, %v2604_v40  ;;  %v3432_v63 = vadd.f32 %v2603_v39, %v565_v56  ;;  %v676_v0 = vadd.f32 %v675_v43, %v674_v19 }
 0x19d   :  { %v2916_v61 = vpop.eup %2915  ;;  %v730_v62 = vadd.f32 %v729_v58, %v728_v45  ;;  %v682_v1 = vrot.slane %v681_v55, 4  ;;  %2921 = vpow2.f32 %v654_v57  ;;  %v568_v4 = vadd.f32 %v2566_v59, %v3351_v53 }
 0x19e   :  { %v841_v3 = vmul.f32 %v2916_v61, %v3387_v36  ;;  %v3436_v5 = vmul.f32 0.0625, %v669_v33  ;;  %v2918_v7 = vpop.eup %2917  ;;  %v642_v9 = vmul.f32 2.0, %v3432_v63  ;;  %v688_v10 = vsel %vm660_vm0, %v3432_v63, 0.0 }
 0x19f   :  { %v731_v8 = vrot.slane %v730_v62, 4  ;;  %v708_v11 = vmul.f32 %v3432_v63, %v3432_v63  ;;  %v842_v13 = vmul.f32 %v2918_v7, %v3387_v36  ;;  %v3444_v15 = vadd.f32 %v2606_v60, %v568_v4 }
 0x1a0   :  { %v843_v16 = vadd.f32 %v841_v3, %v839_v12  ;;  %v677_v17 = vrot.slane %v676_v0, 1  ;;  %v656_v53 = vmul.f32 1.442695, %v642_v9  ;;  %v683_v22 = vadd.f32 %v682_v1, %v681_v55 }
 0x1a1   :  { %v732_v18 = vadd.f32 %v731_v8, %v730_v62  ;;  %v737_v19 = vsel %vm660_vm0, %v708_v11, 0.0  ;;  %v844_v23 = vadd.f32 %v842_v13, %v840_v21  ;;  %v643_v24 = vmul.f32 2.0, %v3444_v15 }
 0x1a2   :  { %v689_v25 = vsel %vm660_vm0, %v3444_v15, 0.0  ;;  %v709_v26 = vmul.f32 %v3444_v15, %v3444_v15  ;;  %2923 = vpow2.f32 %v656_v53  ;;  %v678_v27 = vadd.f32 %v677_v17, %v676_v0 }
 0x1a3   :  { %v684_v29 = vrot.slane %v683_v22, 2  ;;  %v690_v30 = vadd.f32 %v689_v25, %v688_v10  ;;  %v658_v12 = vmul.f32 1.442695, %v643_v24  ;;  %v717_v33 = vrot.slane %v3414_v20, 1 }
 0x1a4   :  { %v738_v32 = vsel %vm660_vm0, %v709_v26, 0.0  ;;  %v725_v37 = vadd.f32 %v724_v54, %v723_v35  ;;  %v2920_v39 = vpop.eup %2919  ;;  %v3454_v43 = vmul.f32 0.0625, %v678_v27  ;;  %v733_v56 = vrot.slane %v732_v18, 2 }
 0x1a5   :  { %v739_v21 = vadd.f32 %v738_v32, %v737_v19  ;;  %v685_v40 = vadd.f32 %v684_v29, %v683_v22  ;;  %v691_v42 = vrot.slane %v690_v30, 4  ;;  %v845_v45 = vmul.f32 %v2920_v39, %v3390_v38 }
 0x1a6   :  { %2925 = vpow2.f32 %v658_v12  ;;  %v718_v46 = vadd.f32 %v717_v33, %v3414_v20  ;;  %v726_v47 = vrot.slane %v725_v37, 1  ;;  %v750_v54 = vmul.f32 %v3436_v5, %v3436_v5 }
 0x1a7   :  { %v740_v48 = vrot.slane %v739_v21, 4  ;;  %v686_v52 = vrot.slane %v685_v40, 1  ;;  %v692_v55 = vadd.f32 %v691_v42, %v690_v30  ;;  %v2922_v57 = vpop.eup %2921  ;;  %v847_v58 = vadd.f32 %v845_v45, %v843_v16 }
 0x1a8   :  { %v727_v59 = vadd.f32 %v726_v47, %v725_v37  ;;  %v746_v35 = vmul.f32 0.0625, %v718_v46  ;;  %v846_v60 = vmul.f32 %v2922_v57, %v3390_v38  ;;  %v734_v0 = vadd.f32 %v733_v56, %v732_v18 }
 0x1a9   :  { %v687_v61 = vadd.f32 %v686_v52, %v685_v40  ;;  %v693_v62 = vrot.slane %v692_v55, 2  ;;  %v741_v1 = vadd.f32 %v740_v48, %v739_v21  ;;  %v751_v20 = vmul.f32 %v3454_v43, %v3454_v43 }
 0x1aa   :  { %v747_v3 = vmul.f32 0.0625, %v727_v59  ;;  %v754_v4 = vsub.f32 %v746_v35, %v750_v54  ;;  %v848_v7 = vadd.f32 %v846_v60, %v844_v23  ;;  %v735_v10 = vrot.slane %v734_v0, 1 }
 0x1ab   :  { %v694_v8 = vadd.f32 %v693_v62, %v692_v55  ;;  %v3463_v9 = vmul.f32 0.0625, %v687_v61  ;;  %v742_v11 = vrot.slane %v741_v1, 2  ;;  %v3475_v57 = vsub.s32 1, %v3339_v49 }
 0x1ac   :  { %v755_v13 = vsub.f32 %v747_v3, %v751_v20  ;;  %v758_v16 = vmax.f32 %v754_v4, 0.0  ;;  %v2924_v17 = vpop.eup %2923  ;;  %v736_v19 = vadd.f32 %v735_v10, %v734_v0 }
 0x1ad   :  { %v695_v53 = vrot.slane %v694_v8, 1  ;;  %v752_v18 = vmul.f32 %v3463_v9, %v3463_v9  ;;  %v849_v22 = vmul.f32 %v2924_v17, %v3398_v44  ;;  %v743_v24 = vadd.f32 %v742_v11, %v741_v1 }
 0x1ae   :  { %v759_v25 = vmax.f32 %v755_v13, 0.0  ;;  %v762_v26 = vadd.f32 1e-05, %v758_v16  ;;  %v748_v23 = vmul.f32 0.0625, %v736_v19 }
 0x1af   :  { %v696_v27 = vadd.f32 %v695_v53, %v694_v8  ;;  %v851_v30 = vadd.f32 %v849_v22, %v847_v58  ;;  %v744_v12 = vrot.slane %v743_v24, 1 }
 0x1b0   :  { %v2926_v29 = vpop.eup %2925  ;;  %v763_v32 = vadd.f32 1e-05, %v759_v25  ;;  %2927 = vrsqrt.f32 %v762_v26  ;;  %v756_v39 = vsub.f32 %v748_v23, %v752_v18  ;;  %v2697_v23 = vld [vmem:[#allocation13 + $0x4] ss:$16 sps:$4 sm:$0xff]  }
 0x1b1   :  { %v850_v33 = vmul.f32 %v2926_v29, %v3398_v44  ;;  %v3469_v37 = vmul.f32 0.0625, %v696_v27  ;;  %2929 = vrsqrt.f32 %v851_v30  ;;  %v745_v40 = vadd.f32 %v744_v12, %v743_v24  ;;  %v2700_v12 = vld [vmem:[#allocation13 + $0x24] ss:$16 sps:$4 sm:$0xff]   ;;  %1015 = vmatprep.subr.bf16.mxu0 %v2697_v23  ;;  %v2743_v23 = vld [vmem:[#allocation15 + $0x80] ss:$16 sps:$4 sm:$0xff]  }
 0x1b2   :  { %v760_v42 = vmax.f32 %v756_v39, 0.0  ;;  %2931 = vrsqrt.f32 %v763_v32  ;;  %vm855_vm1 = vcmp.eq.f32.partialorder %v851_v30, inf  ;;  %vm857_vm2 = vcmp.eq.f32.partialorder %v851_v30, 0.0  ;;  %v2709_v39 = vld [vmem:[#allocation13 + $0x2c] ss:$16 sps:$4 sm:$0xff]  }
 0x1b3   :  { %v852_v21 = vadd.f32 %v850_v33, %v848_v7  ;;  %v753_v45 = vmul.f32 %v3469_v37, %v3469_v37  ;;  %v749_v46 = vmul.f32 0.0625, %v745_v40  ;;  %v858_v61 = vand.u32 2147483648, %v851_v30  ;;  %v2698_v33 = vld [vmem:[#allocation13 + $0x20] ss:$16 sps:$4 sm:$0xff]  }
 0x1b4   :  { %v764_v47 = vadd.f32 1e-05, %v760_v42  ;;  %v2703_v42 = vld [vmem:[#allocation13 + $0x44] ss:$16 sps:$4 sm:$0xff]  }
 0x1b5   :  { %2933 = vrsqrt.f32 %v852_v21  ;;  %v757_v48 = vsub.f32 %v749_v46, %v753_v45  ;;  %vm862_vm3 = vcmp.eq.f32.partialorder %v852_v21, inf  ;;  %v865_v16 = vand.u32 2147483648, %v852_v21 }
 0x1b6   :  { %2935 = vrsqrt.f32 %v764_v47  ;;  %vm864_vm4 = vcmp.eq.f32.partialorder %v852_v21, 0.0 }
 0x1b7   :  { %v761_v55 = vmax.f32 %v757_v48, 0.0  ;;  %v2701_v48 = vld [vmem:[#allocation13 + $0x40] ss:$16 sps:$4 sm:$0xff]  }
 0x1b9   :  { %v765_v59 = vadd.f32 1e-05, %v761_v55  ;;  %v2712_v55 = vld [vmem:[#allocation13 + $0x64] ss:$16 sps:$4 sm:$0xff]  }
 0x1ba   :  { %v2928_v52 = vpop.eup %2927 }
 0x1bb   :  { %v770_v56 = vmul.f32 %v2928_v52, %v3347_v51  ;;  %v2930_v58 = vpop.eup %2929  ;;  %2937 = vrsqrt.f32 %v765_v59  ;;  %v2710_v59 = vld [vmem:[#allocation13 + $0x60] ss:$16 sps:$4 sm:$0xff]  }
 0x1bc   :  { %v854_v35 = vmul.f32 %v2930_v58, %v851_v30  ;;  %v2932_v60 = vpop.eup %2931 }
 0x1bd   :  { %v775_v54 = vmul.f32 %v3384_v34, %v770_v56  ;;  %v771_v1 = vmul.f32 %v2932_v60, %v3347_v51  ;;  %v3157_v60 = vmov 0  }
 0x1be   :  { %v856_v0 = vsel %vm855_vm1, %v851_v30, %v854_v35  ;;  %v2718_v35 = vld [vmem:[#allocation13 + $0x6c] ss:$16 sps:$4 sm:$0xff]   ;;  %1047 = vmatprep.mubr.bf16.mxu0 %v3157_v60  ;;  %1090 = vmatprep.mubr.bf16.mxu1 %v3157_v60 }
 0x1bf   :  { %v2934_v62 = vpop.eup %2933  ;;  %v787_v3 = vmul.f32 %v775_v54, %v3436_v5  ;;  %v802_v20 = vrot.slane %v775_v54, %v3475_v57  ;;  %v859_v4 = vsel %vm857_vm2, %v858_v61, %v856_v0  ;;  %v777_v34 = vmul.f32 %v3387_v36, %v771_v1  ;;  %v2796_v60 = vld [vmem:[#allocation15 + $0x18c] ss:$16 sps:$4 sm:$0xff]  }
 0x1c0   :  { %v861_v7 = vmul.f32 %v2934_v62, %v852_v21  ;;  %869 = vrot.lane.b32.xlu1 %v859_v4, %s3154_s3  ;;  %v2936_v11 = vpop.eup %2935 }
 0x1c1   :  { %v803_v8 = vmul.f32 %v802_v20, %v3354_v2  ;;  %v804_v10 = vmul.f32 %v802_v20, %v3362_v6  ;;  %v772_v17 = vmul.f32 %v2936_v11, %v3347_v51  ;;  %v788_v5 = vmul.f32 %v777_v34, %v3454_v43  ;;  %v2695_v43 = vld [vmem:[#allocation13] ss:$16 sps:$4 sm:$0xff]   ;;  %v2724_v11 = vld [vmem:[#allocation15 + $0xc] ss:$16 sps:$4 sm:$0xff]  }
 0x1c2   :  { %v863_v13 = vsel %vm862_vm3, %v852_v21, %v861_v7  ;;  %v808_v53 = vrot.slane %v777_v34, %v3475_v57  ;;  %1016 = vmatpush1.bf16.msra.mxu0 %v2695_v43  ;;  %v2748_v43 = vld [vmem:[#allocation15 + $0x8c] ss:$16 sps:$4 sm:$0xff]  }
 0x1c3   :  { %v866_v19 = vsel %vm864_vm4, %v865_v16, %v863_v13  ;;  %v779_v18 = vmul.f32 %v3390_v38, %v772_v17  ;;  %v789_v36 = vadd.f32 %v788_v5, %v787_v3  ;;  %1017 = vmatprep.subr.bf16.mxu0 %v2700_v12  ;;  %v2719_v13 = vld [vmem:[#allocation15] ss:$16 sps:$4 sm:$0xff]   ;;  %v2722_v16 = vld [vmem:[#allocation15 + $0x8] ss:$16 sps:$4 sm:$0xff]   ;;  %v2727_v17 = vld [vmem:[#allocation15 + $0x24] ss:$16 sps:$4 sm:$0xff]  }
 0x1c4   :  { %871 = vrot.lane.b32.xlu1 %v866_v19, %s3154_s3  ;;  %v809_v2 = vmul.f32 %v808_v53, %v3380_v31  ;;  %v810_v6 = vmul.f32 %v808_v53, %v3395_v41  ;;  %v2704_v31 = vld [vmem:[#allocation13 + $0x8] ss:$16 sps:$4 sm:$0xff]   ;;  %v2706_v41 = vld [vmem:[#allocation13 + $0xc] ss:$16 sps:$4 sm:$0xff]   ;;  %v2725_v53 = vld [vmem:[#allocation15 + $0x20] ss:$16 sps:$4 sm:$0xff]  }
 0x1c5   :  { %v790_v22 = vmul.f32 %v779_v18, %v3463_v9  ;;  %v816_v24 = vrot.slane %v779_v18, %v3475_v57  ;;  %v2938_v27 = vpop.eup %2937  ;;  %1058 = vmatprep.subr.bf16.mxu1 %v2706_v41  ;;  %v2730_v5 = vld [vmem:[#allocation15 + $0x2c] ss:$16 sps:$4 sm:$0xff]   ;;  %v2728_v19 = vld [vmem:[#allocation15 + $0x28] ss:$16 sps:$4 sm:$0xff]   ;;  %v2733_v18 = vld [vmem:[#allocation15 + $0x44] ss:$16 sps:$4 sm:$0xff]  }
 0x1c6   :  { %v811_v25 = vadd.f32 %v809_v2, %v803_v8  ;;  %v812_v26 = vadd.f32 %v810_v6, %v804_v10  ;;  %v773_v29 = vmul.f32 %v2938_v27, %v3347_v51  ;;  %1059 = vmatpush1.bf16.msra.mxu1 %v2704_v31  ;;  %1018 = vmatpush1.bf16.msra.mxu0 %v2698_v33  ;;  %v2731_v2 = vld [vmem:[#allocation15 + $0x40] ss:$16 sps:$4 sm:$0xff]   ;;  %v2734_v6 = vld [vmem:[#allocation15 + $0x48] ss:$16 sps:$4 sm:$0xff]   ;;  %v2745_v27 = vld [vmem:[#allocation15 + $0x84] ss:$16 sps:$4 sm:$0xff]  }
 0x1c7   :  { %v791_v30 = vadd.f32 %v790_v22, %v789_v36  ;;  %v817_v38 = vmul.f32 %v816_v24, %v3411_v14  ;;  %v818_v32 = vmul.f32 %v816_v24, %v3422_v28  ;;  %v2707_v14 = vld [vmem:[#allocation13 + $0x28] ss:$16 sps:$4 sm:$0xff]   ;;  %1060 = vmatprep.subr.bf16.mxu1 %v2709_v39  ;;  %v2715_v28 = vld [vmem:[#allocation13 + $0x4c] ss:$16 sps:$4 sm:$0xff]   ;;  %1019 = vmatprep.subr.bf16.mxu0 %v2703_v42  ;;  %v2739_v22 = vld [vmem:[#allocation15 + $0x64] ss:$16 sps:$4 sm:$0xff]  }
 0x1c8   :  { %v781_v9 = vmul.f32 %v3398_v44, %v773_v29  ;;  %v2736_v36 = vld [vmem:[#allocation15 + $0x4c] ss:$16 sps:$4 sm:$0xff]   ;;  %v2746_v29 = vld [vmem:[#allocation15 + $0x88] ss:$16 sps:$4 sm:$0xff]   ;;  %v2757_v31 = vld [vmem:[#allocation15 + $0xc4] ss:$16 sps:$4 sm:$0xff]  }
 0x1c9   :  { %v819_v21 = vadd.f32 %v817_v38, %v811_v25  ;;  %v820_v40 = vadd.f32 %v818_v32, %v812_v26  ;;  %v2742_v24 = vld [vmem:[#allocation15 + $0x6c] ss:$16 sps:$4 sm:$0xff]   ;;  %v2737_v25 = vld [vmem:[#allocation15 + $0x60] ss:$16 sps:$4 sm:$0xff]   ;;  %v2740_v26 = vld [vmem:[#allocation15 + $0x68] ss:$16 sps:$4 sm:$0xff]  }
 0x1ca   :  { %v792_v45 = vmul.f32 %v781_v9, %v3469_v37  ;;  %v824_v46 = vrot.slane %v781_v9, %v3475_v57  ;;  %1061 = vmatpush1.bf16.msra.mxu1 %v2707_v14  ;;  %v2713_v37 = vld [vmem:[#allocation13 + $0x48] ss:$16 sps:$4 sm:$0xff]   ;;  %1020 = vmatpush1.bf16.msra.mxu0 %v2701_v48  ;;  %v2754_v12 = vld [vmem:[#allocation15 + $0xac] ss:$16 sps:$4 sm:$0xff]   ;;  %v2749_v38 = vld [vmem:[#allocation15 + $0xa0] ss:$16 sps:$4 sm:$0xff]  }
 0x1cb   :  { %1062 = vmatprep.subr.bf16.mxu1 %v2715_v28  ;;  %1021 = vmatprep.subr.bf16.mxu0 %v2712_v55  ;;  %v2752_v32 = vld [vmem:[#allocation15 + $0xa8] ss:$16 sps:$4 sm:$0xff]   ;;  %v2760_v41 = vld [vmem:[#allocation15 + $0xcc] ss:$16 sps:$4 sm:$0xff]   ;;  %v2755_v9 = vld [vmem:[#allocation15 + $0xc0] ss:$16 sps:$4 sm:$0xff]  }
 0x1cc   :  { %v793_v47 = vadd.f32 %v792_v45, %v791_v30  ;;  %v825_v44 = vmul.f32 %v824_v46, %v3432_v63  ;;  %v826_v52 = vmul.f32 %v824_v46, %v3444_v15  ;;  %v785_v63 = vstv %s784_s29  ;;  %v2716_v15 = vld [vmem:[#allocation13 + $0x68] ss:$16 sps:$4 sm:$0xff]   ;;  %v2751_v30 = vld [vmem:[#allocation15 + $0xa4] ss:$16 sps:$4 sm:$0xff]   ;;  %v2772_v46 = vld [vmem:[#allocation15 + $0x10c] ss:$16 sps:$4 sm:$0xff]  }
 0x1cd   :  { %v786_v54 = vmul.f32 %v785_v63, %v3347_v51  ;;  %v2721_v51 = vld [vmem:[#allocation15 + $0x4] ss:$16 sps:$4 sm:$0xff]   ;;  %v2758_v33 = vld [vmem:[#allocation15 + $0xc8] ss:$16 sps:$4 sm:$0xff]   ;;  %v2767_v14 = vld [vmem:[#allocation15 + $0x100] ss:$16 sps:$4 sm:$0xff]  }
 0x1ce   :  { %795 = vrot.lane.b32.xlu0 %v793_v47, %s3154_s3  ;;  %v827_v56 = vadd.f32 %v825_v44, %v819_v21  ;;  %v828_v58 = vadd.f32 %v826_v52, %v820_v40  ;;  %1063 = vmatpush1.bf16.msra.mxu1 %v2713_v37  ;;  %v2763_v39 = vld [vmem:[#allocation15 + $0xe4] ss:$16 sps:$4 sm:$0xff]   ;;  %v2766_v21 = vld [vmem:[#allocation15 + $0xec] ss:$16 sps:$4 sm:$0xff]   ;;  %v2761_v40 = vld [vmem:[#allocation15 + $0xe0] ss:$16 sps:$4 sm:$0xff]  }
 0x1cf   :  { %1022 = vmatpush1.bf16.msra.mxu0 %v2710_v59  ;;  %1064 = vmatprep.subr.bf16.mxu1 %v2718_v35  ;;  %v2764_v42 = vld [vmem:[#allocation15 + $0xe8] ss:$16 sps:$4 sm:$0xff]   ;;  %v2769_v45 = vld [vmem:[#allocation15 + $0x104] ss:$16 sps:$4 sm:$0xff]   ;;  %v2778_v48 = vld [vmem:[#allocation15 + $0x12c] ss:$16 sps:$4 sm:$0xff]  }
 0x1d0   :  { %2129 = vmatprep.subr.bf16.mxu0 %v2721_v51  ;;  %v2770_v28 = vld [vmem:[#allocation15 + $0x108] ss:$16 sps:$4 sm:$0xff]   ;;  %v2775_v47 = vld [vmem:[#allocation15 + $0x124] ss:$16 sps:$4 sm:$0xff]   ;;  %v2773_v44 = vld [vmem:[#allocation15 + $0x120] ss:$16 sps:$4 sm:$0xff]  }
 0x1d1   :  { %v2776_v52 = vld [vmem:[#allocation15 + $0x128] ss:$16 sps:$4 sm:$0xff]   ;;  %v2781_v55 = vld [vmem:[#allocation15 + $0x144] ss:$16 sps:$4 sm:$0xff]   ;;  %v2784_v37 = vld [vmem:[#allocation15 + $0x14c] ss:$16 sps:$4 sm:$0xff]  }
 0x1d2   :  { %1065 = vmatpush1.bf16.msra.mxu1 %v2716_v15  ;;  %v2785_v59 = vld [vmem:[#allocation15 + $0x160] ss:$16 sps:$4 sm:$0xff]   ;;  %v2787_v63 = vld [vmem:[#allocation15 + $0x164] ss:$16 sps:$4 sm:$0xff]   ;;  %v2788_v15 = vld [vmem:[#allocation15 + $0x168] ss:$16 sps:$4 sm:$0xff]  }
 0x1d3   :  { %2215 = vmatprep.subr.bf16.mxu1 %v2724_v11  ;;  %v2790_v35 = vld [vmem:[#allocation15 + $0x16c] ss:$16 sps:$4 sm:$0xff]   ;;  %v2809_v11 = vld [vmem:[#allocation15 + $0x1e0] ss:$16 sps:$4 sm:$0xff]  }
 0x1d4   :  { %v2814_v51 = vld [vmem:[#allocation15 + $0x1ec] ss:$16 sps:$4 sm:$0xff]  }
 0x232   :  { %v870_v1 = vpop.permute.xlu1 %869 }
 0x236   :  { %v872_v7 = vpop.permute.xlu1 %871 }
 0x240   :  { %v796_v61 = vpop.permute.xlu0 %795 }
 0x241   :  { %v798_v62 = vsub.f32 %v786_v54, %v796_v61  ;;  %v2793_v54 = vld [vmem:[#allocation15 + $0x184] ss:$16 sps:$4 sm:$0xff]   ;;  %v2791_v61 = vld [vmem:[#allocation15 + $0x180] ss:$16 sps:$4 sm:$0xff]  }
 0x243   :  { %v832_v0 = vrot.slane %v798_v62, %v3475_v57  ;;  %v2794_v62 = vld [vmem:[#allocation15 + $0x188] ss:$16 sps:$4 sm:$0xff]  }
 0x245   :  { %834 = vrot.lane.b32.xlu0 %v832_v0, %s3154_s3  ;;  %v2799_v0 = vld [vmem:[#allocation15 + $0x1a4] ss:$16 sps:$4 sm:$0xff]  }
 0x2b7   :  { %v835_v3 = vpop.permute.xlu0 %834 }
 0x2b8   :  { %v837_v20 = vadd.f32 %v835_v3, %v827_v56  ;;  %v838_v4 = vadd.f32 %v835_v3, %v828_v58  ;;  %v2779_v56 = vld [vmem:[#allocation15 + $0x140] ss:$16 sps:$4 sm:$0xff]   ;;  %v2782_v58 = vld [vmem:[#allocation15 + $0x148] ss:$16 sps:$4 sm:$0xff]  }
 0x2b9   :  { %v2797_v3 = vld [vmem:[#allocation15 + $0x1a0] ss:$16 sps:$4 sm:$0xff]  }
 0x2ba   :  { %v875_v34 = vadd.f32 %v870_v1, %v837_v20  ;;  %v876_v8 = vadd.f32 %v872_v7, %v838_v4  ;;  %v2802_v1 = vld [vmem:[#allocation15 + $0x1ac] ss:$16 sps:$4 sm:$0xff]   ;;  %v2800_v20 = vld [vmem:[#allocation15 + $0x1a8] ss:$16 sps:$4 sm:$0xff]   ;;  %v2805_v4 = vld [vmem:[#allocation15 + $0x1c4] ss:$16 sps:$4 sm:$0xff]  }
 0x2bb   :  { %v2808_v7 = vld [vmem:[#allocation15 + $0x1cc] ss:$16 sps:$4 sm:$0xff]  }
 0x2bc   :  { %v877_v10 = vpack.c.bf16 %v876_v8, %v875_v34  ;;  %v2803_v34 = vld [vmem:[#allocation15 + $0x1c0] ss:$16 sps:$4 sm:$0xff]   ;;  %v2806_v8 = vld [vmem:[#allocation15 + $0x1c8] ss:$16 sps:$4 sm:$0xff]  }
 0x2be   :  { %2397 = vmatmul.mubr.msk.bf16.vlgmr.msra.gmra.mrb[16].mxu0 %vm660_vm0, %v877_v10  ;;  %2398 = vmatmul.mubr.msk.bf16.vlgmr.msra.gmra.mrb[16].mxu1 %vm660_vm0, %v877_v10  ;;  %v2811_v10 = vld [vmem:[#allocation15 + $0x1e4] ss:$16 sps:$4 sm:$0xff]  }
 0x2bf   :  { %2130 = vmatpush1.bf16.msra.mxu0 %v2719_v13  ;;  %2216 = vmatpush1.bf16.msra.mxu1 %v2722_v16  ;;  %v2812_v13 = vld [vmem:[#allocation15 + $0x1e8] ss:$16 sps:$4 sm:$0xff]   ;;  %v2817_v16 = vld [vmem:[#allocation15 + $0x204] ss:$16 sps:$4 sm:$0xff]  }
 0x2c0   :  { %2131 = vmatprep.subr.bf16.mxu0 %v2727_v17  ;;  %2217 = vmatprep.subr.bf16.mxu1 %v2730_v5  ;;  %v2820_v17 = vld [vmem:[#allocation15 + $0x20c] ss:$16 sps:$4 sm:$0xff]  }
 0x2c1   :  { %v3515_v5 = vld [vmem:[%s3624_s8] sm:$0xff] }
 0x2c3   :  { %2132 = vmatpush1.bf16.msra.mxu0 %v2725_v53  ;;  %2218 = vmatpush1.bf16.msra.mxu1 %v2728_v19  ;;  %v3520_v53 = vld [vmem:[%s3624_s8 + $0x8] sm:$0xff]  ;;  %v902_v19 = vsub.s32 4, %v3339_v49  ;;  %s3158_s8 = smov [#allocation16]  }
 0x2c4   :  { %2133 = vmatprep.subr.bf16.mxu0 %v2733_v18  ;;  %2219 = vmatprep.subr.bf16.mxu1 %v2736_v36  ;;  %v899_v18 = vrot.slane %v3515_v5, %v3342_v50  ;;  %v907_v36 = vrot.slane %v3520_v53, %v3342_v50  ;;  %s2314_s3 = sshll.u32 %s3158_s8, 4  ;;  %s2315_s3 = int_to_ptr.vmem [resolvable:$true] %s2314_s3 }
 0x2c5   :  { %s3111_s16 = scalar_lea.vmem %s2315_s3, 1024  ;;  %p3116_p4 = scmp.lt.s32.totalorder %s2315_s3, %s2315_s3 }
 0x2c6   :  { %p3112_p3 = scmp.ne.s32.totalorder %s2315_s3, %s3111_s16  ;;  %p3117_p5 = scmp.lt.s32.totalorder %s3111_s16, %s3111_s16 }
 0x2c7   :  { %2134 = vmatpush1.bf16.msra.mxu0 %v2731_v2  ;;  %2220 = vmatpush1.bf16.msra.mxu1 %v2734_v6  ;;  %v903_v2 = vrot.slane %v3515_v5, %v902_v19  ;;  %v911_v6 = vrot.slane %v3520_v53, %v902_v19 }
 0x2c8   :  { %2135 = vmatprep.subr.bf16.mxu0 %v2739_v22  ;;  %2221 = vmatprep.subr.bf16.mxu1 %v2742_v24  ;;  %v919_v22 = vrot.slane %v899_v18, %v3342_v50  ;;  %v927_v24 = vrot.slane %v907_v36, %v3342_v50  ;;  %p3118_p6 = por %p3117_p5, %p3116_p4 }
 0x2ca   :  { %p3119_p7 = pnand %p3118_p6, %p3112_p3 }
 0x2cb   :  { %2136 = vmatpush1.bf16.msra.mxu0 %v2737_v25  ;;  %2222 = vmatpush1.bf16.msra.mxu1 %v2740_v26  ;;  %v923_v25 = vrot.slane %v903_v2, %v3342_v50  ;;  %v931_v26 = vrot.slane %v911_v6, %v3342_v50 }
 0x2cc   :  { %2137 = vmatprep.subr.bf16.mxu0 %v2745_v27  ;;  %2223 = vmatprep.subr.bf16.mxu1 %v2748_v43 }
 0x2cf   :  { %2138 = vmatpush1.bf16.msra.mxu0 %v2743_v23  ;;  %2224 = vmatpush1.bf16.msra.mxu1 %v2746_v29 }
 0x2d0   :  { %2139 = vmatprep.subr.bf16.mxu0 %v2751_v30  ;;  %2225 = vmatprep.subr.bf16.mxu1 %v2754_v12 }
 0x2d3   :  { %2140 = vmatpush1.bf16.msra.mxu0 %v2749_v38  ;;  %2226 = vmatpush1.bf16.msra.mxu1 %v2752_v32 }
 0x2d4   :  { %2141 = vmatprep.subr.bf16.mxu0 %v2757_v31  ;;  %2227 = vmatprep.subr.bf16.mxu1 %v2760_v41 }
 0x2d7   :  { %2142 = vmatpush1.bf16.msra.mxu0 %v2755_v9  ;;  %2228 = vmatpush1.bf16.msra.mxu1 %v2758_v33 }
 0x2d8   :  { %2143 = vmatprep.subr.bf16.mxu0 %v2763_v39  ;;  %2229 = vmatprep.subr.bf16.mxu1 %v2766_v21 }
 0x2db   :  { %2144 = vmatpush1.bf16.msra.mxu0 %v2761_v40  ;;  %2230 = vmatpush1.bf16.msra.mxu1 %v2764_v42 }
 0x2dc   :  { %2145 = vmatprep.subr.bf16.mxu0 %v2769_v45  ;;  %2231 = vmatprep.subr.bf16.mxu1 %v2772_v46 }
 0x2df   :  { %2146 = vmatpush1.bf16.msra.mxu0 %v2767_v14  ;;  %2232 = vmatpush1.bf16.msra.mxu1 %v2770_v28 }
 0x2e0   :  { %2147 = vmatprep.subr.bf16.mxu0 %v2775_v47  ;;  %2233 = vmatprep.subr.bf16.mxu1 %v2778_v48 }
 0x2e3   :  { %2148 = vmatpush1.bf16.msra.mxu0 %v2773_v44  ;;  %2234 = vmatpush1.bf16.msra.mxu1 %v2776_v52 }
 0x2e4   :  { %2149 = vmatprep.subr.bf16.mxu0 %v2781_v55  ;;  %2235 = vmatprep.subr.bf16.mxu1 %v2784_v37 }
 0x2e7   :  { %2150 = vmatpush1.bf16.msra.mxu0 %v2779_v56  ;;  %2236 = vmatpush1.bf16.msra.mxu1 %v2782_v58 }
 0x2e8   :  { %2151 = vmatprep.subr.bf16.mxu0 %v2787_v63  ;;  %2237 = vmatprep.subr.bf16.mxu1 %v2790_v35 }
 0x2eb   :  { %2152 = vmatpush1.bf16.msra.mxu0 %v2785_v59  ;;  %2238 = vmatpush1.bf16.msra.mxu1 %v2788_v15 }
 0x2ec   :  { %2153 = vmatprep.subr.bf16.mxu0 %v2793_v54  ;;  %2239 = vmatprep.subr.bf16.mxu1 %v2796_v60 }
 0x2ef   :  { %2154 = vmatpush1.bf16.msra.mxu0 %v2791_v61  ;;  %2240 = vmatpush1.bf16.msra.mxu1 %v2794_v62 }
 0x2f0   :  { %2155 = vmatprep.subr.bf16.mxu0 %v2799_v0  ;;  %2241 = vmatprep.subr.bf16.mxu1 %v2802_v1 }
 0x2f3   :  { %2156 = vmatpush1.bf16.msra.mxu0 %v2797_v3  ;;  %2242 = vmatpush1.bf16.msra.mxu1 %v2800_v20 }
 0x2f4   :  { %2157 = vmatprep.subr.bf16.mxu0 %v2805_v4  ;;  %2243 = vmatprep.subr.bf16.mxu1 %v2808_v7 }
 0x2f7   :  { %2158 = vmatpush1.bf16.msra.mxu0 %v2803_v34  ;;  %2244 = vmatpush1.bf16.msra.mxu1 %v2806_v8 }
 0x2f8   :  { %2159 = vmatprep.subr.bf16.mxu0 %v2811_v10  ;;  %2245 = vmatprep.subr.bf16.mxu1 %v2814_v51 }
 0x2fb   :  { %2160 = vmatpush1.bf16.msra.mxu0 %v2809_v11  ;;  %2246 = vmatpush1.bf16.msra.mxu1 %v2812_v13 }
 0x2fc   :  { %2172 = vmatprep.subr.bf16.mxu0 %v2817_v16  ;;  %2258 = vmatprep.subr.bf16.mxu1 %v2820_v17 }
 0x391   :  { %v1049_v27 = vpop.f32.mrb[16].mxu0  ;;  %v1092_v43 = vpop.f32.mrb[16].mxu1 }
 0x392   :  { %v3533_v23 = vadd.f32 %v1049_v27, %v919_v22  ;;  %v3535_v29 = vadd.f32 %v1092_v43, %v927_v24  ;;  %v1051_v30 = vpop.f32.mrb[17].mxu0  ;;  %v1094_v12 = vpop.f32.mrb[17].mxu1 }
 0x393   :  { %v3537_v38 = vadd.f32 %v1051_v30, %v923_v25  ;;  %v3539_v32 = vadd.f32 %v1094_v12, %v931_v26  ;;  %v1053_v31 = vpop.f32.mrb[18].mxu0  ;;  %v1096_v41 = vpop.f32.mrb[18].mxu1 }
 0x394   :  { %v1133_v9 = vmul.f32 %v3533_v23, %v3533_v23  ;;  %v1135_v50 = vmul.f32 %v3535_v29, %v3535_v29  ;;  %v3545_v33 = vadd.f32 %v1053_v31, %v919_v22  ;;  %v3547_v39 = vadd.f32 %v1096_v41, %v927_v24  ;;  %v1055_v21 = vpop.f32.mrb[19].mxu0  ;;  %v1098_v40 = vpop.f32.mrb[19].mxu1 }
 0x395   :  { %v1134_v42 = vmul.f32 %v3537_v38, %v3537_v38  ;;  %v1136_v45 = vmul.f32 %v3539_v32, %v3539_v32  ;;  %v3553_v46 = vadd.f32 %v1055_v21, %v923_v25  ;;  %v3555_v14 = vadd.f32 %v1098_v40, %v931_v26 }
 0x396   :  { %v1101_v28 = vadd.f32 %v3545_v33, %v3533_v23  ;;  %v1137_v47 = vmul.f32 %v3545_v33, %v3545_v33  ;;  %v1115_v48 = vadd.f32 %v3547_v39, %v3535_v29  ;;  %v1139_v44 = vmul.f32 %v3547_v39, %v3547_v39 }
 0x397   :  { %v1108_v52 = vadd.f32 %v3553_v46, %v3537_v38  ;;  %v1138_v55 = vmul.f32 %v3553_v46, %v3553_v46  ;;  %v1122_v37 = vadd.f32 %v3555_v14, %v3539_v32  ;;  %v1140_v56 = vmul.f32 %v3555_v14, %v3555_v14 }
 0x398   :  { %v1102_v58 = vrot.slane %v1101_v28, 4  ;;  %v1141_v59 = vadd.f32 %v1137_v47, %v1133_v9  ;;  %v1116_v63 = vrot.slane %v1115_v48, 4  ;;  %v1155_v15 = vadd.f32 %v1139_v44, %v1135_v50 }
 0x399   :  { %v1109_v35 = vrot.slane %v1108_v52, 4  ;;  %v1148_v54 = vadd.f32 %v1138_v55, %v1134_v42  ;;  %v1123_v60 = vrot.slane %v1122_v37, 4  ;;  %v1162_v61 = vadd.f32 %v1140_v56, %v1136_v45 }
 0x39a   :  { %v1103_v62 = vadd.f32 %v1102_v58, %v1101_v28  ;;  %v1142_v0 = vrot.slane %v1141_v59, 4  ;;  %v1117_v1 = vadd.f32 %v1116_v63, %v1115_v48  ;;  %v1156_v3 = vrot.slane %v1155_v15, 4 }
 0x39b   :  { %v1110_v20 = vadd.f32 %v1109_v35, %v1108_v52  ;;  %v1149_v4 = vrot.slane %v1148_v54, 4  ;;  %v1124_v7 = vadd.f32 %v1123_v60, %v1122_v37  ;;  %v1163_v34 = vrot.slane %v1162_v61, 4 }
 0x39c   :  { %v1104_v8 = vrot.slane %v1103_v62, 2  ;;  %v1143_v10 = vadd.f32 %v1142_v0, %v1141_v59  ;;  %v1118_v51 = vrot.slane %v1117_v1, 2  ;;  %v1157_v11 = vadd.f32 %v1156_v3, %v1155_v15 }
 0x39d   :  { %v1111_v13 = vrot.slane %v1110_v20, 2  ;;  %v1150_v16 = vadd.f32 %v1149_v4, %v1148_v54  ;;  %v1125_v17 = vrot.slane %v1124_v7, 2  ;;  %v1164_v19 = vadd.f32 %v1163_v34, %v1162_v61 }
 0x39e   :  { %v1105_v18 = vadd.f32 %v1104_v8, %v1103_v62  ;;  %v1144_v36 = vrot.slane %v1143_v10, 2  ;;  %v1119_v2 = vadd.f32 %v1118_v51, %v1117_v1  ;;  %v1158_v6 = vrot.slane %v1157_v11, 2 }
 0x39f   :  { %v1112_v22 = vadd.f32 %v1111_v13, %v1110_v20  ;;  %v1151_v24 = vrot.slane %v1150_v16, 2  ;;  %v1126_v25 = vadd.f32 %v1125_v17, %v1124_v7  ;;  %v1165_v26 = vrot.slane %v1164_v19, 2 }
 0x3a0   :  { %v1106_v27 = vrot.slane %v1105_v18, 1  ;;  %v1145_v43 = vadd.f32 %v1144_v36, %v1143_v10  ;;  %v1120_v30 = vrot.slane %v1119_v2, 1  ;;  %v1159_v12 = vadd.f32 %v1158_v6, %v1157_v11 }
 0x3a1   :  { %v1113_v31 = vrot.slane %v1112_v22, 1  ;;  %v1152_v41 = vadd.f32 %v1151_v24, %v1150_v16  ;;  %v1127_v9 = vrot.slane %v1126_v25, 1  ;;  %v1166_v50 = vadd.f32 %v1165_v26, %v1164_v19 }
 0x3a2   :  { %v1107_v21 = vadd.f32 %v1106_v27, %v1105_v18  ;;  %v1146_v40 = vrot.slane %v1145_v43, 1  ;;  %v1121_v42 = vadd.f32 %v1120_v30, %v1119_v2  ;;  %v1160_v45 = vrot.slane %v1159_v12, 1 }
 0x3a3   :  { %v1114_v28 = vadd.f32 %v1113_v31, %v1112_v22  ;;  %v1153_v47 = vrot.slane %v1152_v41, 1  ;;  %v1128_v48 = vadd.f32 %v1127_v9, %v1126_v25  ;;  %v1167_v44 = vrot.slane %v1166_v50, 1 }
 0x3a4   :  { %v1129_v52 = vmul.f32 0.0625, %v1107_v21  ;;  %v1147_v55 = vadd.f32 %v1146_v40, %v1145_v43  ;;  %v1131_v37 = vmul.f32 0.0625, %v1121_v42  ;;  %v1161_v56 = vadd.f32 %v1160_v45, %v1159_v12 }
 0x3a5   :  { %v1130_v58 = vmul.f32 0.0625, %v1114_v28  ;;  %v1154_v59 = vadd.f32 %v1153_v47, %v1152_v41  ;;  %v1132_v63 = vmul.f32 0.0625, %v1128_v48  ;;  %v1168_v15 = vadd.f32 %v1167_v44, %v1166_v50 }
 0x3a6   :  { %v1169_v35 = vmul.f32 0.0625, %v1147_v55  ;;  %v1173_v54 = vmul.f32 %v1129_v52, %v1129_v52  ;;  %v1171_v60 = vmul.f32 0.0625, %v1161_v56  ;;  %v1175_v61 = vmul.f32 %v1131_v37, %v1131_v37 }
 0x3a7   :  { %v1170_v62 = vmul.f32 0.0625, %v1154_v59  ;;  %v1174_v0 = vmul.f32 %v1130_v58, %v1130_v58  ;;  %v1172_v1 = vmul.f32 0.0625, %v1168_v15  ;;  %v1176_v3 = vmul.f32 %v1132_v63, %v1132_v63 }
 0x3a8   :  { %v1177_v20 = vsub.f32 %v1169_v35, %v1173_v54  ;;  %v1179_v4 = vsub.f32 %v1171_v60, %v1175_v61  ;;  %v1213_v26 = vsub.s32 5, %v3339_v49  ;;  %v1271_v50 = vsub.s32 2, %v3339_v49 }
 0x3a9   :  { %v1178_v7 = vsub.f32 %v1170_v62, %v1174_v0  ;;  %v1180_v34 = vsub.f32 %v1172_v1, %v1176_v3 }
 0x3aa   :  { %v1181_v8 = vmax.f32 %v1177_v20, 0.0  ;;  %v1183_v10 = vmax.f32 %v1179_v4, 0.0 }
 0x3ab   :  { %v1182_v51 = vmax.f32 %v1178_v7, 0.0  ;;  %v1184_v11 = vmax.f32 %v1180_v34, 0.0 }
 0x3ac   :  { %v1185_v13 = vadd.f32 1e-05, %v1181_v8  ;;  %v1187_v16 = vadd.f32 1e-05, %v1183_v10 }
 0x3ad   :  { %v1186_v17 = vadd.f32 1e-05, %v1182_v51  ;;  %v1188_v19 = vadd.f32 1e-05, %v1184_v11 }
 0x3ae   :  { %2939 = vrsqrt.f32 %v1185_v13 }
 0x3af   :  { %2941 = vrsqrt.f32 %v1187_v16 }
 0x3b0   :  { %2943 = vrsqrt.f32 %v1186_v17 }
 0x3b1   :  { %2945 = vrsqrt.f32 %v1188_v19 }
 0x3b8   :  { %v2940_v18 = vpop.eup %2939 }
 0x3b9   :  { %v2942_v36 = vpop.eup %2941 }
 0x3ba   :  { %v2944_v2 = vpop.eup %2943 }
 0x3bb   :  { %v2946_v6 = vpop.eup %2945  ;;  %v1197_v22 = vcombine.low %v2940_v18, %v2944_v2 }
 0x3bc   :  { %v1198_v24 = vcombine.low %v2942_v36, %v2946_v6  ;;  %v2815_v6 = vld [vmem:[#allocation15 + $0x200] ss:$16 sps:$4 sm:$0xff]  }
 0x3bd   :  { %v1199_v25 = vrot.slane %v1197_v22, 7  ;;  %v2818_v22 = vld [vmem:[#allocation15 + $0x208] ss:$16 sps:$4 sm:$0xff]  }
 0x3be   :  { %v1200_v27 = vrot.slane %v1198_v24, 7 }
 0x3bf   :  { %v1203_v43 = vmul.f32 %v1199_v25, %v3515_v5 }
 0x3c0   :  { %v1204_v30 = vmul.f32 %v1200_v27, %v3520_v53  ;;  %v2823_v27 = vld [vmem:[#allocation15 + $0x224] ss:$16 sps:$4 sm:$0xff]  }
 0x3c1   :  { %v1210_v12 = vrot.slane %v1203_v43, %v3475_v57  ;;  %v1214_v31 = vrot.slane %v1203_v43, %v1213_v26  ;;  %v2826_v43 = vld [vmem:[#allocation15 + $0x22c] ss:$16 sps:$4 sm:$0xff]  }
 0x3c2   :  { %v1218_v41 = vrot.slane %v1204_v30, %v3475_v57  ;;  %v1222_v9 = vrot.slane %v1204_v30, %v1213_v26  ;;  %v2821_v30 = vld [vmem:[#allocation15 + $0x220] ss:$16 sps:$4 sm:$0xff]  }
 0x3c3   :  { %v1234_v21 = vrot.slane %v1214_v31, %v3475_v57  ;;  %v1251_v40 = vmul.f32 %v1210_v12, %v1129_v52  ;;  %v1252_v42 = vmul.f32 %v1214_v31, %v1130_v58  ;;  %v1230_v45 = vrot.slane %v1210_v12, %v3475_v57  ;;  %v2824_v12 = vld [vmem:[#allocation15 + $0x228] ss:$16 sps:$4 sm:$0xff]   ;;  %v2829_v31 = vld [vmem:[#allocation15 + $0x244] ss:$16 sps:$4 sm:$0xff]  }
 0x3c4   :  { %v1242_v28 = vrot.slane %v1222_v9, %v3475_v57  ;;  %v1253_v47 = vmul.f32 %v1218_v41, %v1131_v37  ;;  %v1254_v48 = vmul.f32 %v1222_v9, %v1132_v63  ;;  %v1238_v44 = vrot.slane %v1218_v41, %v3475_v57  ;;  %v2832_v41 = vld [vmem:[#allocation15 + $0x24c] ss:$16 sps:$4 sm:$0xff]   ;;  %v2827_v9 = vld [vmem:[#allocation15 + $0x240] ss:$16 sps:$4 sm:$0xff]  }
 0x3c5   :  { %v1248_v55 = vmul.f32 %v1234_v21, %v3553_v46  ;;  %v1259_v56 = vcombine.low %v1251_v40, %v1252_v42  ;;  %v1244_v59 = vmul.f32 %v1234_v21, %v3537_v38  ;;  %v1243_v15 = vmul.f32 %v1230_v45, %v3533_v23  ;;  %v2835_v21 = vld [vmem:[#allocation15 + $0x264] ss:$16 sps:$4 sm:$0xff]   ;;  %v2838_v40 = vld [vmem:[#allocation15 + $0x26c] ss:$16 sps:$4 sm:$0xff]   ;;  %v2833_v42 = vld [vmem:[#allocation15 + $0x260] ss:$16 sps:$4 sm:$0xff]  }
 0x3c6   :  { %v1250_v35 = vmul.f32 %v1242_v28, %v3555_v14  ;;  %v1260_v54 = vcombine.low %v1253_v47, %v1254_v48  ;;  %v1247_v52 = vmul.f32 %v1230_v45, %v3545_v33  ;;  %v1246_v58 = vmul.f32 %v1242_v28, %v3539_v32  ;;  %v2836_v45 = vld [vmem:[#allocation15 + $0x268] ss:$16 sps:$4 sm:$0xff]   ;;  %v2841_v28 = vld [vmem:[#allocation15 + $0x284] ss:$16 sps:$4 sm:$0xff]   ;;  %v2844_v47 = vld [vmem:[#allocation15 + $0x28c] ss:$16 sps:$4 sm:$0xff]  }
 0x3c7   :  { %v1261_v60 = vrot.slane %v1259_v56, 6  ;;  %v1275_v37 = vsub.s32 6, %v3339_v49  ;;  %v1245_v63 = vmul.f32 %v1238_v44, %v3535_v29  ;;  %v1249_v57 = vmul.f32 %v1238_v44, %v3547_v39  ;;  %v2839_v48 = vld [vmem:[#allocation15 + $0x280] ss:$16 sps:$4 sm:$0xff]   ;;  %v2842_v44 = vld [vmem:[#allocation15 + $0x288] ss:$16 sps:$4 sm:$0xff]  }
 0x3c8   :  { %v1262_v46 = vrot.slane %v1260_v54, 6  ;;  %v2850_v56 = vld [vmem:[#allocation15 + $0x2ac] ss:$16 sps:$4 sm:$0xff]  }
 0x3c9   :  { %v1265_v61 = vsub.f32 %v3515_v5, %v1261_v60  ;;  %v2856_v54 = vld [vmem:[#allocation15 + $0x2cc] ss:$16 sps:$4 sm:$0xff]   ;;  %v2859_v60 = vld [vmem:[#allocation15 + $0x2e4] ss:$16 sps:$4 sm:$0xff]  }
 0x3ca   :  { %v1266_v38 = vsub.f32 %v3520_v53, %v1262_v46  ;;  %v2865_v46 = vld [vmem:[#allocation15 + $0x304] ss:$16 sps:$4 sm:$0xff]  }
 0x3cb   :  { %v1276_v23 = vrot.slane %v1265_v61, %v1275_v37  ;;  %v1272_v62 = vrot.slane %v1265_v61, %v1271_v50  ;;  %v2868_v61 = vld [vmem:[#allocation15 + $0x30c] ss:$16 sps:$4 sm:$0xff]  }
 0x3cc   :  { %v1284_v14 = vrot.slane %v1266_v38, %v1275_v37  ;;  %v1280_v0 = vrot.slane %v1266_v38, %v1271_v50  ;;  %v2862_v37 = vld [vmem:[#allocation15 + $0x2ec] ss:$16 sps:$4 sm:$0xff]   ;;  %v2863_v38 = vld [vmem:[#allocation15 + $0x300] ss:$16 sps:$4 sm:$0xff]  }
 0x3cd   :  { %v1296_v1 = vrot.slane %v1276_v23, %v1271_v50  ;;  %v1292_v33 = vrot.slane %v1272_v62, %v1271_v50  ;;  %v2866_v23 = vld [vmem:[#allocation15 + $0x308] ss:$16 sps:$4 sm:$0xff]   ;;  %v2871_v62 = vld [vmem:[#allocation15 + $0x324] ss:$16 sps:$4 sm:$0xff]  }
 0x3ce   :  { %v1304_v3 = vrot.slane %v1284_v14, %v1271_v50  ;;  %v1300_v32 = vrot.slane %v1280_v0, %v1271_v50  ;;  %v2830_v50 = vld [vmem:[#allocation15 + $0x248] ss:$16 sps:$4 sm:$0xff]   ;;  %v2874_v14 = vld [vmem:[#allocation15 + $0x32c] ss:$16 sps:$4 sm:$0xff]   ;;  %v2869_v0 = vld [vmem:[#allocation15 + $0x320] ss:$16 sps:$4 sm:$0xff]  }
 0x3cf   :  { %v1306_v20 = vadd.f32 %v1296_v1, %v1244_v59  ;;  %v1310_v4 = vadd.f32 %v1296_v1, %v1248_v55  ;;  %v1305_v7 = vadd.f32 %v1292_v33, %v1243_v15  ;;  %v1309_v34 = vadd.f32 %v1292_v33, %v1247_v52  ;;  %v2847_v55 = vld [vmem:[#allocation15 + $0x2a4] ss:$16 sps:$4 sm:$0xff]   ;;  %v2845_v59 = vld [vmem:[#allocation15 + $0x2a0] ss:$16 sps:$4 sm:$0xff]   ;;  %v2848_v15 = vld [vmem:[#allocation15 + $0x2a8] ss:$16 sps:$4 sm:$0xff]  }
 0x3d0   :  { %v1308_v29 = vadd.f32 %v1304_v3, %v1246_v58  ;;  %v1312_v8 = vadd.f32 %v1304_v3, %v1250_v35  ;;  %v1307_v39 = vadd.f32 %v1300_v32, %v1245_v63  ;;  %v1311_v10 = vadd.f32 %v1300_v32, %v1249_v57  ;;  %v2853_v35 = vld [vmem:[#allocation15 + $0x2c4] ss:$16 sps:$4 sm:$0xff]   ;;  %v2851_v52 = vld [vmem:[#allocation15 + $0x2c0] ss:$16 sps:$4 sm:$0xff]   ;;  %v2854_v58 = vld [vmem:[#allocation15 + $0x2c8] ss:$16 sps:$4 sm:$0xff]  }
 0x3d1   :  { %v1314_v51 = vmax.f32 %v1306_v20, 0.0  ;;  %v1318_v11 = vmax.f32 %v1310_v4, 0.0  ;;  %v1313_v13 = vmax.f32 %v1305_v7, 0.0  ;;  %v1317_v16 = vmax.f32 %v1309_v34, 0.0  ;;  %v2857_v63 = vld [vmem:[#allocation15 + $0x2e0] ss:$16 sps:$4 sm:$0xff]  }
 0x3d2   :  { %v1316_v17 = vmax.f32 %v1308_v29, 0.0  ;;  %v1320_v19 = vmax.f32 %v1312_v8, 0.0  ;;  %v1315_v18 = vmax.f32 %v1307_v39, 0.0  ;;  %v1319_v36 = vmax.f32 %v1311_v10, 0.0  ;;  %v2860_v57 = vld [vmem:[#allocation15 + $0x2e8] ss:$16 sps:$4 sm:$0xff]  }
 0x3d3   :  { %v1322_v2 = vpack.c.bf16 %v1318_v11, %v1314_v51  ;;  %v1321_v24 = vpack.c.bf16 %v1317_v16, %v1313_v13  ;;  %v2872_v1 = vld [vmem:[#allocation15 + $0x328] ss:$16 sps:$4 sm:$0xff]   ;;  %v2877_v33 = vld [vmem:[#allocation15 + $0x344] ss:$16 sps:$4 sm:$0xff]   ;;  %v2880_v3 = vld [vmem:[#allocation15 + $0x34c] ss:$16 sps:$4 sm:$0xff]  }
 0x3d4   :  { %v1324_v25 = vpack.c.bf16 %v1320_v19, %v1316_v17  ;;  %v3594_v26 = vpack.c.bf16 %v1319_v36, %v1315_v18  ;;  %v2875_v32 = vld [vmem:[#allocation15 + $0x340] ss:$16 sps:$4 sm:$0xff]   ;;  %v2878_v20 = vld [vmem:[#allocation15 + $0x348] ss:$16 sps:$4 sm:$0xff]   ;;  %v2883_v4 = vld [vmem:[#allocation15 + $0x364] ss:$16 sps:$4 sm:$0xff]  }
 0x3d5   :  { %2161 = vmatprep.mubr.bf16.mxu0 %v1322_v2  ;;  %2247 = vmatprep.mubr.bf16.mxu1 %v1322_v2  ;;  %v2886_v7 = vld [vmem:[#allocation15 + $0x36c] ss:$16 sps:$4 sm:$0xff]   ;;  %v2881_v34 = vld [vmem:[#allocation15 + $0x360] ss:$16 sps:$4 sm:$0xff]   ;;  %v2884_v29 = vld [vmem:[#allocation15 + $0x368] ss:$16 sps:$4 sm:$0xff]  }
 0x3d6   :  { %2162 = vmatmul.mubr.bf16.vlgmr.msra.gmra.mrb[20].mxu0 %v1321_v24  ;;  %2248 = vmatmul.mubr.bf16.vlgmr.msra.gmra.mrb[20].mxu1 %v1321_v24  ;;  %v2889_v8 = vld [vmem:[#allocation15 + $0x384] ss:$16 sps:$4 sm:$0xff]   ;;  %v2892_v39 = vld [vmem:[#allocation15 + $0x38c] ss:$16 sps:$4 sm:$0xff]   ;;  %v2887_v10 = vld [vmem:[#allocation15 + $0x380] ss:$16 sps:$4 sm:$0xff]  }
 0x3d7   :  { %2173 = vmatpush1.bf16.msra.mxu0 %v2815_v6  ;;  %2259 = vmatpush1.bf16.msra.mxu1 %v2818_v22  ;;  %v2890_v51 = vld [vmem:[#allocation15 + $0x388] ss:$16 sps:$4 sm:$0xff]   ;;  %v2895_v11 = vld [vmem:[#allocation15 + $0x3a4] ss:$16 sps:$4 sm:$0xff]   ;;  %v2898_v13 = vld [vmem:[#allocation15 + $0x3ac] ss:$16 sps:$4 sm:$0xff]  }
 0x3d8   :  { %2204 = vmatprep.mubr.bf16.mxu0 %v1324_v25  ;;  %2290 = vmatprep.mubr.bf16.mxu1 %v1324_v25  ;;  %v2893_v16 = vld [vmem:[#allocation15 + $0x3a0] ss:$16 sps:$4 sm:$0xff]   ;;  %v2896_v17 = vld [vmem:[#allocation15 + $0x3a8] ss:$16 sps:$4 sm:$0xff]   ;;  %v2901_v19 = vld [vmem:[#allocation15 + $0x3c4] ss:$16 sps:$4 sm:$0xff]  }
 0x3d9   :  { %2174 = vmatprep.subr.bf16.mxu0 %v2823_v27  ;;  %2260 = vmatprep.subr.bf16.mxu1 %v2826_v43  ;;  %v2904_v18 = vld [vmem:[#allocation15 + $0x3cc] ss:$16 sps:$4 sm:$0xff]   ;;  %v2899_v36 = vld [vmem:[#allocation15 + $0x3c0] ss:$16 sps:$4 sm:$0xff]   ;;  %v2902_v2 = vld [vmem:[#allocation15 + $0x3c8] ss:$16 sps:$4 sm:$0xff]  }
 0x3da   :  { %v2907_v6 = vld [vmem:[#allocation15 + $0x3e4] ss:$16 sps:$4 sm:$0xff]   ;;  %v2910_v22 = vld [vmem:[#allocation15 + $0x3ec] ss:$16 sps:$4 sm:$0xff]   ;;  %v2905_v24 = vld [vmem:[#allocation15 + $0x3e0] ss:$16 sps:$4 sm:$0xff]  }
 0x3db   :  { %2175 = vmatpush1.bf16.msra.mxu0 %v2821_v30  ;;  %2261 = vmatpush1.bf16.msra.mxu1 %v2824_v12  ;;  %v2908_v25 = vld [vmem:[#allocation15 + $0x3e8] ss:$16 sps:$4 sm:$0xff]   ;;  %v1455_v27 = vsub.s32 3, %v3339_v49  ;;  %v1459_v43 = vsub.s32 7, %v3339_v49 }
 0x3dc   :  { %2176 = vmatprep.subr.bf16.mxu0 %v2829_v31  ;;  %2262 = vmatprep.subr.bf16.mxu1 %v2832_v41 }
 0x3dd   :  { %v1456_v30 = vrot.slane %v3515_v5, %v1455_v27  ;;  %v1464_v12 = vrot.slane %v3520_v53, %v1455_v27  ;;  %v1460_v31 = vrot.slane %v3515_v5, %v1459_v43  ;;  %v1468_v41 = vrot.slane %v3520_v53, %v1459_v43 }
 0x3df   :  { %2177 = vmatpush1.bf16.msra.mxu0 %v2827_v9  ;;  %2263 = vmatpush1.bf16.msra.mxu1 %v2830_v50  ;;  %v1476_v9 = vrot.slane %v1456_v30, %v1455_v27  ;;  %v1484_v50 = vrot.slane %v1464_v12, %v1455_v27 }
 0x3e0   :  { %2178 = vmatprep.subr.bf16.mxu0 %v2835_v21  ;;  %2264 = vmatprep.subr.bf16.mxu1 %v2838_v40  ;;  %v1480_v21 = vrot.slane %v1460_v31, %v1455_v27  ;;  %v1488_v40 = vrot.slane %v1468_v41, %v1455_v27 }
 0x3e3   :  { %2179 = vmatpush1.bf16.msra.mxu0 %v2833_v42  ;;  %2265 = vmatpush1.bf16.msra.mxu1 %v2836_v45 }
 0x3e4   :  { %2180 = vmatprep.subr.bf16.mxu0 %v2841_v28  ;;  %2266 = vmatprep.subr.bf16.mxu1 %v2844_v47 }
 0x3e7   :  { %2181 = vmatpush1.bf16.msra.mxu0 %v2839_v48  ;;  %2267 = vmatpush1.bf16.msra.mxu1 %v2842_v44 }
 0x3e8   :  { %2182 = vmatprep.subr.bf16.mxu0 %v2847_v55  ;;  %2268 = vmatprep.subr.bf16.mxu1 %v2850_v56 }
 0x3eb   :  { %2183 = vmatpush1.bf16.msra.mxu0 %v2845_v59  ;;  %2269 = vmatpush1.bf16.msra.mxu1 %v2848_v15 }
 0x3ec   :  { %2184 = vmatprep.subr.bf16.mxu0 %v2853_v35  ;;  %2270 = vmatprep.subr.bf16.mxu1 %v2856_v54 }
 0x3ef   :  { %2185 = vmatpush1.bf16.msra.mxu0 %v2851_v52  ;;  %2271 = vmatpush1.bf16.msra.mxu1 %v2854_v58 }
 0x3f0   :  { %2186 = vmatprep.subr.bf16.mxu0 %v2859_v60  ;;  %2272 = vmatprep.subr.bf16.mxu1 %v2862_v37 }
 0x3f3   :  { %2187 = vmatpush1.bf16.msra.mxu0 %v2857_v63  ;;  %2273 = vmatpush1.bf16.msra.mxu1 %v2860_v57 }
 0x3f4   :  { %2188 = vmatprep.subr.bf16.mxu0 %v2865_v46  ;;  %2274 = vmatprep.subr.bf16.mxu1 %v2868_v61 }
 0x3f7   :  { %2189 = vmatpush1.bf16.msra.mxu0 %v2863_v38  ;;  %2275 = vmatpush1.bf16.msra.mxu1 %v2866_v23 }
 0x3f8   :  { %2190 = vmatprep.subr.bf16.mxu0 %v2871_v62  ;;  %2276 = vmatprep.subr.bf16.mxu1 %v2874_v14 }
 0x3fb   :  { %2191 = vmatpush1.bf16.msra.mxu0 %v2869_v0  ;;  %2277 = vmatpush1.bf16.msra.mxu1 %v2872_v1 }
 0x3fc   :  { %2192 = vmatprep.subr.bf16.mxu0 %v2877_v33  ;;  %2278 = vmatprep.subr.bf16.mxu1 %v2880_v3 }
 0x3ff   :  { %2193 = vmatpush1.bf16.msra.mxu0 %v2875_v32  ;;  %2279 = vmatpush1.bf16.msra.mxu1 %v2878_v20 }
 0x400   :  { %2194 = vmatprep.subr.bf16.mxu0 %v2883_v4  ;;  %2280 = vmatprep.subr.bf16.mxu1 %v2886_v7 }
 0x403   :  { %2195 = vmatpush1.bf16.msra.mxu0 %v2881_v34  ;;  %2281 = vmatpush1.bf16.msra.mxu1 %v2884_v29 }
 0x404   :  { %2196 = vmatprep.subr.bf16.mxu0 %v2889_v8  ;;  %2282 = vmatprep.subr.bf16.mxu1 %v2892_v39 }
 0x407   :  { %2197 = vmatpush1.bf16.msra.mxu0 %v2887_v10  ;;  %2283 = vmatpush1.bf16.msra.mxu1 %v2890_v51 }
 0x408   :  { %2198 = vmatprep.subr.bf16.mxu0 %v2895_v11  ;;  %2284 = vmatprep.subr.bf16.mxu1 %v2898_v13 }
 0x40b   :  { %2199 = vmatpush1.bf16.msra.mxu0 %v2893_v16  ;;  %2285 = vmatpush1.bf16.msra.mxu1 %v2896_v17 }
 0x40c   :  { %2200 = vmatprep.subr.bf16.mxu0 %v2901_v19  ;;  %2286 = vmatprep.subr.bf16.mxu1 %v2904_v18 }
 0x40f   :  { %2201 = vmatpush1.bf16.msra.mxu0 %v2899_v36  ;;  %2287 = vmatpush1.bf16.msra.mxu1 %v2902_v2 }
 0x410   :  { %2202 = vmatprep.subr.bf16.mxu0 %v2907_v6  ;;  %2288 = vmatprep.subr.bf16.mxu1 %v2910_v22 }
 0x413   :  { %2203 = vmatpush1.bf16.msra.mxu0 %v2905_v24  ;;  %2289 = vmatpush1.bf16.msra.mxu1 %v2908_v25 }
 0x416   :  { %2205 = vmatmul.mubr.bf16.vlgmr.msra.gmra.mrb[20].mxu0 %v3594_v26  ;;  %2291 = vmatmul.mubr.bf16.vlgmr.msra.gmra.mrb[20].mxu1 %v3594_v26 }
 0x4e9   :  { %v2206_v42 = vpop.f32.mrb[20].mxu0  ;;  %v2292_v45 = vpop.f32.mrb[20].mxu1 }
 0x4ea   :  { %v2607_v28 = vadd.f32 %v2206_v42, %v1476_v9  ;;  %v2611_v26 = vadd.f32 %v2292_v45, %v1484_v50  ;;  %v2208_v47 = vpop.f32.mrb[21].mxu0  ;;  %v2294_v48 = vpop.f32.mrb[21].mxu1 }
 0x4eb   :  { %v2608_v49 = vadd.f32 %v2208_v47, %v1480_v21  ;;  %v2612_v44 = vadd.f32 %v2294_v48, %v1488_v40  ;;  %v2210_v55 = vpop.f32.mrb[22].mxu0  ;;  %v2296_v56 = vpop.f32.mrb[22].mxu1 }
 0x4ec   :  { %2301 = vst [vmem:[#allocation16] sm:$0xff] %v2607_v28  ;;  %2303 = vst [vmem:[#allocation16 + $0x10] sm:$0xff] %v2611_v26  ;;  %v2609_v5 = vadd.f32 %v2210_v55, %v1476_v9  ;;  %v2613_v53 = vadd.f32 %v2296_v56, %v1484_v50  ;;  %v2212_v59 = vpop.f32.mrb[23].mxu0  ;;  %v2298_v15 = vpop.f32.mrb[23].mxu1 }
 0x4ed   :  { %2302 = vst [vmem:[#allocation16 + $0x8] sm:$0xff] %v2608_v49  ;;  %2304 = vst [vmem:[#allocation16 + $0x18] sm:$0xff] %v2612_v44  ;;  %v2610_v35 = vadd.f32 %v2212_v59, %v1480_v21  ;;  %v2614_v54 = vadd.f32 %v2298_v15, %v1488_v40 }
 0x4ee   :  { %2305 = vst [vmem:[#allocation16 + $0x20] sm:$0xff] %v2609_v5  ;;  %2307 = vst [vmem:[#allocation16 + $0x30] sm:$0xff] %v2613_v53 }
 0x4ef   :  { %2306 = vst [vmem:[#allocation16 + $0x28] sm:$0xff] %v2610_v35  ;;  %2308 = vst [vmem:[#allocation16 + $0x38] sm:$0xff] %v2614_v54 }
 0x4f0   :  { %3122 = shalt.err (!%p3119_p7)
}
 0x4f1   :  { %s3123_s15 = scalar_lea.hbm %s3626_s10, 1024 }
 0x4f2   :  { %p3124_p8 = scmp.ne.s32.totalorder %s3626_s10, %s3123_s15  ;;  %p3127_p9 = scmp.lt.u32.totalorder %s3123_s15, %s3626_s10 }
 0x4f4   :  { %p3129_p10 = pnand %p3127_p9, %p3124_p8 }
 0x4f6   :  { %3132 = shalt.err (!%p3129_p10)
}
 0x4f7   :  { %s3159_s21 = smov 512   ;;  %s3160_s23 = smov 32  }
 0x4f8   :  { %2320 = dma.vmem_to_hbm [thread:$0]  %s2315_s3, 1024, %s3626_s10, [#allocation4], %s3159_s21, %s3159_s21, %s3160_s23  }
 0x4f9   :  { %3143 = dma.done.wait [#allocation4], 1024  }
 0x4fa   :  { %3144 = vsyncadd [#allocation4], 4294966272 }
 0x4fb   :  { %2324 = vsyncpa [#allocation3], 1 }
 0x4fc   :  { %2325 = vsyncpa [#allocation8], 1 }
 0x4fd   :  { %2326 = vsyncpa [#allocation11], 1 }
 0x4fe   :  { %2327 = vsyncpa [#allocation14], 1 }
 0x4ff   :  { %2328 = vsyncpa [#allocation4], 1 }
 0x500   :  { %2329 = vsyncpa [#allocation5], 1 }

</bundles_post_ra>
